<compile_context>
chip_gen: v7x
topology: tpu7x:2x2x1
jax: 0.10.0
libtpu: 0.0.40
codegen_flags: <defaults>
</compile_context>

<pallas_src>
import functools

import jax
import jax.numpy as jnp
from jax.experimental import pallas as pl
from jax.experimental.pallas import tpu as pltpu


# matmul-operand dtype (f32 accumulation via preferred_element_type everywhere).
# Set to jnp.float32 for exact-f32 parity against the PyTorch reference.
MXU_DTYPE = jnp.bfloat16


# ----------------------------- config ---------------------------------------
class SiglipVisionConfig:
    def __init__(self, hidden_size=128, intermediate_size=256, num_hidden_layers=2,
                 num_attention_heads=4, num_channels=3, image_size=32, patch_size=8,
                 layer_norm_eps=2e-06, attention_dropout=0.0):
        self.hidden_size = hidden_size
        self.intermediate_size = intermediate_size
        self.num_hidden_layers = num_hidden_layers
        self.num_attention_heads = num_attention_heads
        self.num_channels = num_channels
        self.image_size = image_size
        self.patch_size = patch_size
        self.layer_norm_eps = layer_norm_eps
        self.attention_dropout = attention_dropout  # 0.0 -> dropout is a no-op


# ----------------------------- kernel helpers --------------------------------
def _layer_norm(x, gamma, beta, eps):
    # x: (M, D) f32; gamma/beta: (1, D).  Biased variance, like torch LayerNorm.
    mu = jnp.mean(x, axis=-1, keepdims=True)
    var = jnp.mean((x - mu) ** 2, axis=-1, keepdims=True)
    return (x - mu) * jax.lax.rsqrt(var + eps) * gamma + beta


def _gelu_tanh(x):
    # matches nn.functional.gelu(..., approximate='tanh'), kept in f32
    c = jnp.sqrt(2.0 / jnp.pi).astype(x.dtype)
    return 0.5 * x * (1.0 + jnp.tanh(c * (x + 0.044715 * x * x * x)))


# ----------------------------- patch-embedding kernel ------------------------
def patch_embed_kernel(patches_ref, pw_ref, pb_ref, pos_ref, out_ref):
    # one image per grid step: (N, K) @ (K, D) + bias + position embedding
    emb = jnp.dot(patches_ref[...], pw_ref[...], preferred_element_type=jnp.float32)
    out_ref[...] = emb + pb_ref[...] + pos_ref[...]


# ----------------------------- fused encoder kernel --------------------------
def encoder_kernel(embed_ref,
                   ln1g_ref, ln1b_ref,
                   wqkv_ref, bqkv_ref,
                   wo_ref, bo_ref,
                   ln2g_ref, ln2b_ref,
                   w1_ref, b1_ref, w2_ref, b2_ref,
                   postg_ref, postb_ref,
                   out_ref,
                   hs_ref, attn_ref,
                   *, n_elems, seq_len, num_heads, head_dim, eps, scale):
    layer = pl.program_id(1)
    d_model = num_heads * head_dim

    # ---- first layer step of each batch block: load embeddings into slab ----
    @pl.when(layer == 0)
    def _():
        hs_ref[...] = embed_ref[...]

    x = hs_ref[...]                       # (rows, D) f32, resident across layers

    # ---- self-attention block ------------------------------------------------
    h = _layer_norm(x, ln1g_ref[0], ln1b_ref[0], eps).astype(MXU_DTYPE)
    # fused QKV projection: one (rows, D) @ (D, 3D) matmul, one bias add
    qkv = (jnp.dot(h, wqkv_ref[0], preferred_element_type=jnp.float32)
           + bqkv_ref[0]).astype(MXU_DTYPE)

    # per-head loop (static, H small); each head is batched over the batch
    # elements with a leading-batch-dim einsum; result goes into VMEM scratch
    # (no concatenates, bounded live ranges).
    for hh in range(num_heads):
        c0 = hh * head_dim
        qh = qkv[:, c0:c0 + head_dim].reshape(n_elems, seq_len, head_dim)
        kh = qkv[:, d_model + c0:d_model + c0 + head_dim].reshape(
            n_elems, seq_len, head_dim)
        vh = qkv[:, 2 * d_model + c0:2 * d_model + c0 + head_dim].reshape(
            n_elems, seq_len, head_dim)
        s = jnp.einsum('bqd,bkd->bqk', qh, kh,
                       preferred_element_type=jnp.float32) * scale
        s = s - jnp.max(s, axis=-1, keepdims=True)
        p = jnp.exp(s)                                                # f32
        inv = pl.reciprocal(jnp.sum(p, axis=-1, keepdims=True), approx=True)
        a = (p * inv).astype(MXU_DTYPE)
        # dropout(p=0.0) is a no-op
        oh = jnp.einsum('bqk,bkd->bqd', a, vh,
                        preferred_element_type=jnp.float32)           # (B, S, hd)
        attn_ref[:, c0:c0 + head_dim] = oh.reshape(n_elems * seq_len, head_dim)

    o = jnp.dot(attn_ref[...].astype(MXU_DTYPE), wo_ref[0],
                preferred_element_type=jnp.float32) + bo_ref[0]
    x = x + o                                                         # residual (f32)

    # ---- MLP block -------------------------------------------------------------
    h = _layer_norm(x, ln2g_ref[0], ln2b_ref[0], eps).astype(MXU_DTYPE)
    h1 = jnp.dot(h, w1_ref[0], preferred_element_type=jnp.float32) + b1_ref[0]
    h1 = _gelu_tanh(h1)                                               # f32
    h2 = jnp.dot(h1.astype(MXU_DTYPE), w2_ref[0],
                 preferred_element_type=jnp.float32) + b2_ref[0]
    x = x + h2                                                        # residual (f32)

    hs_ref[...] = x

    # ---- final layer: post-layernorm + single HBM writeback --------------------
    @pl.when(layer == pl.num_programs(1) - 1)
    def _():
        out_ref[...] = _layer_norm(x, postg_ref[...], postb_ref[...], eps)


# ----------------------------- wrapper ----------------------------------------
def _vmem_limit_bytes():
    """~80% of physical VMEM (128 MiB on v5e/v6e -> ~102 MiB; 64 MiB on v7x -> ~51 MiB)."""
    cap = 64 * 1024 * 1024
    try:
        info = pltpu.get_tpu_info()
        cap = int(getattr(info, "vmem_capacity_bytes", cap))
    except Exception:
        pass
    return max(32 * 1024 * 1024, int(cap * 0.80))


def _pick_elems_per_block(batch, seq_len, d_model, d_ff, act_budget_bytes):
    """Largest divisor of `batch` whose per-step activations fit the budget.

    Fewer, larger batch blocks amortize per-step overhead and per-block weight
    re-fetch (main lever on v5e/v6e).  On v7x, if >=2 'parallel' blocks are
    desired for megacore, shrink the budget to a per-core value.
    """
    f32 = 4
    per_elem = (seq_len * (9 * d_model + 2 * d_ff) * f32        # slabs + qkv + mlp
                + 2 * seq_len * seq_len * f32)                  # one head's scores
    for d in sorted((d for d in range(1, batch + 1) if batch % d == 0), reverse=True):
        if d * per_elem <= act_budget_bytes:
            return d
    return 1


def patchify(pixel_values, patch_size):
    # NCHW -> (B, num_patches, C*P*P), each patch flattened in (C, kh, kw) order
    # to match the PyTorch Conv2d weight layout.
    B, C, Hh, Ww = pixel_values.shape
    P = patch_size
    x = pixel_values.reshape(B, C, Hh // P, P, Ww // P, P)
    x = x.transpose(0, 2, 4, 1, 3, 5)                  # (B, Hp, Wp, C, P, P)
    return x.reshape(B, (Hh // P) * (Ww // P), C * P * P)


def patch_embed_forward(patches2d, params, cfg, batch, seq_len):
    K = patches2d.shape[1]
    D = cfg.hidden_size
    cost = pl.CostEstimate(
        flops=int(2 * batch * seq_len * K * D),
        transcendentals=0,
        bytes_accessed=int(patches2d.size * patches2d.dtype.itemsize
                           + params['patch_w'].size * 2 + 2 * D * 4
                           + seq_len * D * 4 + batch * seq_len * D * 4))
    return pl.pallas_call(
        patch_embed_kernel,
        out_shape=jax.ShapeDtypeStruct((batch * seq_len, D), jnp.float32),
        grid=(batch,),
        in_specs=[
            pl.BlockSpec((seq_len, K), lambda b: (b, 0)),     # patches (per image)
            pl.BlockSpec((K, D), lambda b: (0, 0)),           # patch_w (const)
            pl.BlockSpec((1, D), lambda b: (0, 0)),           # patch_b (const)
            pl.BlockSpec((seq_len, D), lambda b: (0, 0)),     # pos_emb (const, no tile)
        ],
        out_specs=pl.BlockSpec((seq_len, D), lambda b: (b, 0)),
        compiler_params=pltpu.CompilerParams(dimension_semantics=("parallel",)),
        cost_estimate=cost,
    )(patches2d, params['patch_w'], params['patch_b'], params['pos_emb'])


def encoder_forward(embeds, params, cfg, batch, seq_len):
    Mtot, D = embeds.shape
    I = cfg.intermediate_size
    H = cfg.num_attention_heads
    hd = D // H
    L = cfg.num_hidden_layers

    layer_params = (params['ln1_g'], params['ln1_b'],
                    params['wqkv'], params['bqkv'],
                    params['wo'], params['bo'],
                    params['ln2_g'], params['ln2_b'],
                    params['w1'], params['b1'],
                    params['w2'], params['b2'])
    layer_bytes = sum(int(a.size) * a.dtype.itemsize for a in layer_params)
    per_layer_bytes = max(1, layer_bytes // L)

    vmem_limit = _vmem_limit_bytes()
    act_budget = int(0.75 * vmem_limit) - 2 * per_layer_bytes   # 2x: double-buffered weights
    elems = _pick_elems_per_block(batch, seq_len, D, I, act_budget)
    n_blocks = batch // elems
    rows = elems * seq_len                                      # M rows per grid step

    kernel = functools.partial(
        encoder_kernel, n_elems=elems, seq_len=seq_len, num_heads=H, head_dim=hd,
        eps=cfg.layer_norm_eps, scale=hd ** (-0.5))

    def rows_spec(cols):                # batch-block indexed slabs
        return pl.BlockSpec((rows, cols), lambda bb, l: (bb, 0))

    def const_spec(shape):              # loaded once, shared by all steps
        return pl.BlockSpec(shape, lambda bb, l: tuple(0 for _ in shape))

    def layer_spec(shape):              # per-layer stacked weights (shape excl. L)
        blk = (1,) + shape
        return pl.BlockSpec(blk, lambda bb, l: (l,) + tuple(0 for _ in shape))

    in_specs = [
        rows_spec(D),                                   # embeddings (read at layer==0)
        layer_spec((1, D)), layer_spec((1, D)),         # ln1 g/b
        layer_spec((D, 3 * D)), layer_spec((1, 3 * D)), # fused QKV
        layer_spec((D, D)), layer_spec((1, D)),         # out proj
        layer_spec((1, D)), layer_spec((1, D)),         # ln2 g/b
        layer_spec((D, I)), layer_spec((1, I)),         # fc1
        layer_spec((I, D)), layer_spec((1, D)),         # fc2
        const_spec((1, D)), const_spec((1, D)),         # post-ln g/b
    ]

    operands = (embeds,
                params['ln1_g'], params['ln1_b'],
                params['wqkv'], params['bqkv'],
                params['wo'], params['bo'],
                params['ln2_g'], params['ln2_b'],
                params['w1'], params['b1'],
                params['w2'], params['b2'],
                params['post_g'], params['post_b'])

    # advisory cost hint for XLA scheduling (weights counted once per batch block)
    attn_flops = 4 * Mtot * seq_len * D                   # QK^T + PV
    proj_flops = 2 * Mtot * D * 4 * D + 4 * Mtot * D * I  # qkv+o, fc1+fc2
    flops = L * (attn_flops + proj_flops)
    transcendentals = L * (Mtot * H * seq_len + Mtot * I + 2 * Mtot) + Mtot
    const_bytes = sum(int(a.size) * a.dtype.itemsize
                      for a in (params['post_g'], params['post_b']))
    bytes_accessed = 2 * Mtot * D * 4 + n_blocks * layer_bytes + const_bytes
    cost = pl.CostEstimate(flops=int(flops),
                           transcendentals=int(transcendentals),
                           bytes_accessed=int(bytes_accessed))

    return pl.pallas_call(
        kernel,
        out_shape=jax.ShapeDtypeStruct((Mtot, D), jnp.float32),
        grid=(n_blocks, L),
        in_specs=in_specs,
        out_specs=rows_spec(D),
        scratch_shapes=[pltpu.VMEM((rows, D), jnp.float32),   # resident hidden state
                        pltpu.VMEM((rows, D), jnp.float32)],  # per-head attn output
        compiler_params=pltpu.CompilerParams(
            dimension_semantics=("parallel", "arbitrary"),
            vmem_limit_bytes=vmem_limit),
        cost_estimate=cost,
    )(*operands)


def siglip_vision_transformer(pixel_values, params, cfg):
    B = pixel_values.shape[0]
    N = (cfg.image_size // cfg.patch_size) ** 2
    patches = patchify(pixel_values, cfg.patch_size)               # (B, N, K)
    patches2d = patches.reshape(B * N, -1).astype(MXU_DTYPE)       # fold B into M
    embeds = patch_embed_forward(patches2d, params, cfg, B, N)     # (B*N, D) f32
    out2d = encoder_forward(embeds, params, cfg, B, N)             # (B*N, D) f32
    return out2d.reshape(B, N, cfg.hidden_size)


# ----------------------------- params ------------------------------------------
def init_params(cfg, key):
    D, I, C, P = cfg.hidden_size, cfg.intermediate_size, cfg.num_channels, cfg.patch_size
    L = cfg.num_hidden_layers
    N = (cfg.image_size // cfg.patch_size) ** 2
    K = C * P * P
    scale = 0.02
    keys = jax.random.split(key, 7)

    # patch embedding: Conv2d(stride==kernel) rewritten as (K, D) matmul weight
    conv_w = jax.random.normal(keys[0], (D, C, P, P), jnp.float32) * scale
    params = {
        'patch_w': conv_w.reshape(D, K).T.astype(MXU_DTYPE),       # (K, D)
        'patch_b': jnp.zeros((1, D), jnp.float32),
        'pos_emb': jax.random.normal(keys[1], (N, D), jnp.float32) * scale,
        'ln1_g': jnp.ones((L, 1, D), jnp.float32),
        'ln1_b': jnp.zeros((L, 1, D), jnp.float32),
        'ln2_g': jnp.ones((L, 1, D), jnp.float32),
        'ln2_b': jnp.zeros((L, 1, D), jnp.float32),
        'post_g': jnp.ones((1, D), jnp.float32),
        'post_b': jnp.zeros((1, D), jnp.float32),
    }

    def stacked_linear(k, din, dout):
        # pre-transposed so kernels compute  x @ W + b  (PyTorch: x @ W.T + b)
        w = (jax.random.normal(k, (L, din, dout), jnp.float32) * scale).astype(MXU_DTYPE)
        b = jnp.zeros((L, 1, dout), jnp.float32)
        return w, b

    # fused QKV weight: output columns laid out as [Q | K | V]
    params['wqkv'], params['bqkv'] = stacked_linear(keys[2], D, 3 * D)
    params['wo'], params['bo'] = stacked_linear(keys[3], D, D)
    params['w1'], params['b1'] = stacked_linear(keys[4], D, I)
    params['w2'], params['b2'] = stacked_linear(keys[5], I, D)
    return params


# ----------------------------- main ---------------------------------------------
if __name__ == "__main__":
    # D=128 keeps the output store lane-dense (unmasked vst) per the perf review.
    cfg = SiglipVisionConfig(hidden_size=128, intermediate_size=256,
                             num_hidden_layers=2, num_attention_heads=4,
                             num_channels=3, image_size=32, patch_size=8)
    key = jax.random.PRNGKey(0)
    k_x, k_p = jax.random.split(key)
    pixel_values = jax.random.normal(
        k_x, (2, cfg.num_channels, cfg.image_size, cfg.image_size), jnp.float32)
    params = init_params(cfg, k_p)

    fwd = jax.jit(lambda px, pr: siglip_vision_transformer(px, pr, cfg))
    out = jax.block_until_ready(fwd(pixel_values, params))

    N = (cfg.image_size // cfg.patch_size) ** 2
    assert out.shape == (2, N, cfg.hidden_size)
    assert bool(jnp.all(jnp.isfinite(out)))
    print("KERNEL_OK")
</pallas_src>

<mosaic_0001>
module attributes {stable_mosaic.version = 11 : i64} {
  func.func @patch_embed_kernel(%arg0: i32, %arg1: memref<16x192xbf16, #tpu.memory_space<vmem>>, %arg2: memref<192x128xbf16, #tpu.memory_space<vmem>>, %arg3: memref<1x128xf32, #tpu.memory_space<vmem>>, %arg4: memref<16x128xf32, #tpu.memory_space<vmem>>, %arg5: memref<16x128xf32, #tpu.memory_space<vmem>>) attributes {dimension_semantics = [#tpu.dimension_semantics<parallel>], iteration_bounds = array<i64: 2>, scalar_prefetch = 0 : i64, scratch_operands = 0 : i64, tpu.core_type = #tpu.core_type<tc>, window_params = [{transform_indices = @transform_0, window_bounds = array<i64: 16, 192>}, {pipeline_mode = #tpu.pipeline_mode<synchronous>, transform_indices = @transform_1, window_bounds = array<i64: 192, 128>}, {pipeline_mode = #tpu.pipeline_mode<synchronous>, transform_indices = @transform_2, window_bounds = array<i64: 1, 128>}, {pipeline_mode = #tpu.pipeline_mode<synchronous>, transform_indices = @transform_3, window_bounds = array<i64: 16, 128>}, {transform_indices = @transform_4, window_bounds = array<i64: 16, 128>}]} {
    %c0 = arith.constant 0 : index
    %c0_0 = arith.constant 0 : index
    %0 = vector.load %arg1[%c0, %c0_0] : memref<16x192xbf16, #tpu.memory_space<vmem>>, vector<16x192xbf16>
    %c0_1 = arith.constant 0 : index
    %c0_2 = arith.constant 0 : index
    %1 = vector.load %arg2[%c0_1, %c0_2] : memref<192x128xbf16, #tpu.memory_space<vmem>>, vector<192x128xbf16>
    %cst = arith.constant dense<0.000000e+00> : vector<16x128xf32>
    %2 = tpu.matmul %0, %1, %cst {dimension_numbers = #tpu.dot_dimension_numbers<[1], [0], [0], [1], [0, 0, 1, 1], [], []>} : vector<16x192xbf16>, vector<192x128xbf16>, vector<16x128xf32> -> vector<16x128xf32>
    %c0_3 = arith.constant 0 : index
    %c0_4 = arith.constant 0 : index
    %3 = vector.load %arg3[%c0_3, %c0_4] : memref<1x128xf32, #tpu.memory_space<vmem>>, vector<1x128xf32>
    %4 = vector.broadcast %3 : vector<1x128xf32> to vector<16x128xf32>
    %5 = arith.addf %2, %4 : vector<16x128xf32>
    %c0_5 = arith.constant 0 : index
    %c0_6 = arith.constant 0 : index
    %6 = vector.load %arg4[%c0_5, %c0_6] : memref<16x128xf32, #tpu.memory_space<vmem>>, vector<16x128xf32>
    %7 = arith.addf %5, %6 : vector<16x128xf32>
    %c0_7 = arith.constant 0 : index
    %c0_8 = arith.constant 0 : index
    %8 = vector.load %arg5[%c0_7, %c0_8] : memref<16x128xf32, #tpu.memory_space<vmem>>, vector<16x128xf32>
    tpu.vector_store %arg5[%c0_7, %c0_8], %7 {strides = array<i32>} : memref<16x128xf32, #tpu.memory_space<vmem>>, vector<16x128xf32>,
    return
  }
  func.func @transform_0(%arg0: i32) -> (i32, i32) {
    %c0_i32 = arith.constant 0 : i32
    %c0_i32_0 = arith.constant 0 : i32
    return %arg0, %c0_i32 : i32, i32
  }
  func.func @transform_1(%arg0: i32) -> (i32, i32) {
    %c0_i32 = arith.constant 0 : i32
    %c0_i32_0 = arith.constant 0 : i32
    %c0_i32_1 = arith.constant 0 : i32
    return %c0_i32, %c0_i32_0 : i32, i32
  }
  func.func @transform_2(%arg0: i32) -> (i32, i32) {
    %c0_i32 = arith.constant 0 : i32
    %c0_i32_0 = arith.constant 0 : i32
    %c0_i32_1 = arith.constant 0 : i32
    return %c0_i32, %c0_i32_0 : i32, i32
  }
  func.func @transform_3(%arg0: i32) -> (i32, i32) {
    %c0_i32 = arith.constant 0 : i32
    %c0_i32_0 = arith.constant 0 : i32
    %c0_i32_1 = arith.constant 0 : i32
    return %c0_i32, %c0_i32_0 : i32, i32
  }
  func.func @transform_4(%arg0: i32) -> (i32, i32) {
    %c0_i32 = arith.constant 0 : i32
    %c0_i32_0 = arith.constant 0 : i32
    return %arg0, %c0_i32 : i32, i32
  }
}

module attributes {stable_mosaic.version = 11 : i64} {
  func.func @encoder_kernel(%arg0: i32, %arg1: i32, %arg2: memref<32x128xf32, #tpu.memory_space<vmem>>, %arg3: memref<1x1x128xf32, #tpu.memory_space<vmem>>, %arg4: memref<1x1x128xf32, #tpu.memory_space<vmem>>, %arg5: memref<1x128x384xbf16, #tpu.memory_space<vmem>>, %arg6: memref<1x1x384xf32, #tpu.memory_space<vmem>>, %arg7: memref<1x128x128xbf16, #tpu.memory_space<vmem>>, %arg8: memref<1x1x128xf32, #tpu.memory_space<vmem>>, %arg9: memref<1x1x128xf32, #tpu.memory_space<vmem>>, %arg10: memref<1x1x128xf32, #tpu.memory_space<vmem>>, %arg11: memref<1x128x256xbf16, #tpu.memory_space<vmem>>, %arg12: memref<1x1x256xf32, #tpu.memory_space<vmem>>, %arg13: memref<1x256x128xbf16, #tpu.memory_space<vmem>>, %arg14: memref<1x1x128xf32, #tpu.memory_space<vmem>>, %arg15: memref<1x128xf32, #tpu.memory_space<vmem>>, %arg16: memref<1x128xf32, #tpu.memory_space<vmem>>, %arg17: memref<32x128xf32, #tpu.memory_space<vmem>>, %arg18: memref<32x128xf32, #tpu.memory_space<vmem>>, %arg19: memref<32x128xf32, #tpu.memory_space<vmem>>) attributes {dimension_semantics = [#tpu.dimension_semantics<parallel>, #tpu.dimension_semantics<arbitrary>], iteration_bounds = array<i64: 1, 2>, scalar_prefetch = 0 : i64, scratch_operands = 2 : i64, tpu.core_type = #tpu.core_type<tc>, window_params = [{transform_indices = @transform_0, window_bounds = array<i64: 32, 128>}, {transform_indices = @transform_1, window_bounds = array<i64: 1, 1, 128>}, {transform_indices = @transform_2, window_bounds = array<i64: 1, 1, 128>}, {transform_indices = @transform_3, window_bounds = array<i64: 1, 128, 384>}, {transform_indices = @transform_4, window_bounds = array<i64: 1, 1, 384>}, {transform_indices = @transform_5, window_bounds = array<i64: 1, 128, 128>}, {transform_indices = @transform_6, window_bounds = array<i64: 1, 1, 128>}, {transform_indices = @transform_7, window_bounds = array<i64: 1, 1, 128>}, {transform_indices = @transform_8, window_bounds = array<i64: 1, 1, 128>}, {transform_indices = @transform_9, window_bounds = array<i64: 1, 128, 256>}, {transform_indices = @transform_10, window_bounds = array<i64: 1, 1, 256>}, {transform_indices = @transform_11, window_bounds = array<i64: 1, 256, 128>}, {transform_indices = @transform_12, window_bounds = array<i64: 1, 1, 128>}, {pipeline_mode = #tpu.pipeline_mode<synchronous>, transform_indices = @transform_13, window_bounds = array<i64: 1, 128>}, {pipeline_mode = #tpu.pipeline_mode<synchronous>, transform_indices = @transform_14, window_bounds = array<i64: 1, 128>}, {transform_indices = @transform_15, window_bounds = array<i64: 32, 128>}]} {
    %c0_i32 = arith.constant 0 : i32
    %0 = arith.cmpi eq, %arg1, %c0_i32 : i32
    %1 = arith.extui %0 : i1 to i32
    %c0_i32_0 = arith.constant 0 : i32
    %2 = arith.cmpi ne, %1, %c0_i32_0 : i32
    scf.if %2 {
      %c0_85 = arith.constant 0 : index
      %c0_86 = arith.constant 0 : index
      %202 = vector.load %arg2[%c0_85, %c0_86] : memref<32x128xf32, #tpu.memory_space<vmem>>, vector<32x128xf32>
      %c0_87 = arith.constant 0 : index
      %c0_88 = arith.constant 0 : index
      %203 = vector.load %arg18[%c0_87, %c0_88] : memref<32x128xf32, #tpu.memory_space<vmem>>, vector<32x128xf32>
      tpu.vector_store %arg18[%c0_87, %c0_88], %202 {strides = array<i32>} : memref<32x128xf32, #tpu.memory_space<vmem>>, vector<32x128xf32>,
    } else {
    }
    %c0 = arith.constant 0 : index
    %c0_1 = arith.constant 0 : index
    %3 = vector.load %arg18[%c0, %c0_1] : memref<32x128xf32, #tpu.memory_space<vmem>>, vector<32x128xf32>
    %c0_2 = arith.constant 0 : index
    %c0_3 = arith.constant 0 : index
    %c0_4 = arith.constant 0 : index
    %4 = vector.load %arg3[%c0_2, %c0_3, %c0_4] : memref<1x1x128xf32, #tpu.memory_space<vmem>>, vector<1x1x128xf32>
    %5 = vector.shape_cast %4 : vector<1x1x128xf32> to vector<1x128xf32>
    %c0_5 = arith.constant 0 : index
    %c0_6 = arith.constant 0 : index
    %c0_7 = arith.constant 0 : index
    %6 = vector.load %arg4[%c0_5, %c0_6, %c0_7] : memref<1x1x128xf32, #tpu.memory_space<vmem>>, vector<1x1x128xf32>
    %7 = vector.shape_cast %6 : vector<1x1x128xf32> to vector<1x128xf32>
    %cst = arith.constant dense<0.000000e+00> : vector<32xf32>
    %8 = vector.multi_reduction <add>, %3, %cst [1] : vector<32x128xf32> to vector<32xf32>
    %9 = vector.shape_cast %8 : vector<32xf32> to vector<32x1xf32>
    %cst_8 = arith.constant 1.280000e+02 : f32
    %10 = vector.broadcast %cst_8 : f32 to vector<32x1xf32>
    %11 = arith.divf %9, %10 : vector<32x1xf32>
    %12 = vector.broadcast %11 : vector<32x1xf32> to vector<32x128xf32>
    %13 = arith.subf %3, %12 : vector<32x128xf32>
    %14 = arith.mulf %13, %13 : vector<32x128xf32>
    %cst_9 = arith.constant dense<0.000000e+00> : vector<32xf32>
    %15 = vector.multi_reduction <add>, %14, %cst_9 [1] : vector<32x128xf32> to vector<32xf32>
    %16 = vector.shape_cast %15 : vector<32xf32> to vector<32x1xf32>
    %cst_10 = arith.constant 1.280000e+02 : f32
    %17 = vector.broadcast %cst_10 : f32 to vector<32x1xf32>
    %18 = arith.divf %16, %17 : vector<32x1xf32>
    %19 = vector.broadcast %11 : vector<32x1xf32> to vector<32x128xf32>
    %20 = arith.subf %3, %19 : vector<32x128xf32>
    %cst_11 = arith.constant 2.000000e-06 : f32
    %21 = vector.broadcast %cst_11 : f32 to vector<32x1xf32>
    %22 = arith.addf %18, %21 : vector<32x1xf32>
    %23 = math.rsqrt %22 : vector<32x1xf32>
    %24 = vector.broadcast %23 : vector<32x1xf32> to vector<32x128xf32>
    %25 = arith.mulf %20, %24 : vector<32x128xf32>
    %26 = vector.broadcast %5 : vector<1x128xf32> to vector<32x128xf32>
    %27 = arith.mulf %25, %26 : vector<32x128xf32>
    %28 = vector.broadcast %7 : vector<1x128xf32> to vector<32x128xf32>
    %29 = arith.addf %27, %28 : vector<32x128xf32>
    %30 = arith.truncf %29 : vector<32x128xf32> to vector<32x128xbf16>
    %c0_12 = arith.constant 0 : index
    %c0_13 = arith.constant 0 : index
    %c0_14 = arith.constant 0 : index
    %31 = vector.load %arg5[%c0_12, %c0_13, %c0_14] : memref<1x128x384xbf16, #tpu.memory_space<vmem>>, vector<1x128x384xbf16>
    %32 = vector.shape_cast %31 : vector<1x128x384xbf16> to vector<128x384xbf16>
    %cst_15 = arith.constant dense<0.000000e+00> : vector<32x384xf32>
    %33 = tpu.matmul %30, %32, %cst_15 {dimension_numbers = #tpu.dot_dimension_numbers<[1], [0], [0], [1], [0, 0, 1, 1], [], []>} : vector<32x128xbf16>, vector<128x384xbf16>, vector<32x384xf32> -> vector<32x384xf32>
    %c0_16 = arith.constant 0 : index
    %c0_17 = arith.constant 0 : index
    %c0_18 = arith.constant 0 : index
    %34 = vector.load %arg6[%c0_16, %c0_17, %c0_18] : memref<1x1x384xf32, #tpu.memory_space<vmem>>, vector<1x1x384xf32>
    %35 = vector.shape_cast %34 : vector<1x1x384xf32> to vector<1x384xf32>
    %36 = vector.broadcast %35 : vector<1x384xf32> to vector<32x384xf32>
    %37 = arith.addf %33, %36 : vector<32x384xf32>
    %38 = arith.truncf %37 : vector<32x384xf32> to vector<32x384xbf16>
    %39 = vector.extract_strided_slice %38 {offsets = [0, 0], sizes = [32, 32], strides = [1, 1]} : vector<32x384xbf16> to vector<32x32xbf16>
    %40 = vector.shape_cast %39 : vector<32x32xbf16> to vector<2x16x32xbf16>
    %41 = vector.extract_strided_slice %38 {offsets = [0, 128], sizes = [32, 32], strides = [1, 1]} : vector<32x384xbf16> to vector<32x32xbf16>
    %42 = vector.shape_cast %41 : vector<32x32xbf16> to vector<2x16x32xbf16>
    %43 = vector.extract_strided_slice %38 {offsets = [0, 256], sizes = [32, 32], strides = [1, 1]} : vector<32x384xbf16> to vector<32x32xbf16>
    %44 = vector.shape_cast %43 : vector<32x32xbf16> to vector<2x16x32xbf16>
    "tpu.trace_start"() <{level = 10 : i32, message = "bqd,bkd->bqk"}> : () -> ()
    %cst_19 = arith.constant dense<0.000000e+00> : vector<2x16x16xf32>
    %45 = tpu.matmul %40, %42, %cst_19 {dimension_numbers = #tpu.dot_dimension_numbers<[2], [2], [1], [1], [0, 0, 0, 1, 1, 1], [0], [0]>} : vector<2x16x32xbf16>, vector<2x16x32xbf16>, vector<2x16x16xf32> -> vector<2x16x16xf32>
    "tpu.trace_stop"() : () -> ()
    %cst_20 = arith.constant 0.176776692 : f32
    %46 = vector.broadcast %cst_20 : f32 to vector<2x16x16xf32>
    %47 = arith.mulf %45, %46 : vector<2x16x16xf32>
    %cst_21 = arith.constant dense<0xFF800000> : vector<2x16xf32>
    %48 = vector.multi_reduction <maximumf>, %47, %cst_21 [2] : vector<2x16x16xf32> to vector<2x16xf32>
    %49 = vector.shape_cast %48 : vector<2x16xf32> to vector<2x16x1xf32>
    %50 = vector.broadcast %49 : vector<2x16x1xf32> to vector<2x16x16xf32>
    %51 = arith.subf %47, %50 : vector<2x16x16xf32>
    %52 = math.exp %51 : vector<2x16x16xf32>
    %cst_22 = arith.constant dense<0.000000e+00> : vector<2x16xf32>
    %53 = vector.multi_reduction <add>, %52, %cst_22 [2] : vector<2x16x16xf32> to vector<2x16xf32>
    %54 = vector.shape_cast %53 : vector<2x16xf32> to vector<2x16x1xf32>
    %55 = tpu.reciprocal %54 {approx = true} : vector<2x16x1xf32> -> vector<2x16x1xf32>
    %56 = vector.broadcast %55 : vector<2x16x1xf32> to vector<2x16x16xf32>
    %57 = arith.mulf %52, %56 : vector<2x16x16xf32>
    %58 = arith.truncf %57 : vector<2x16x16xf32> to vector<2x16x16xbf16>
    "tpu.trace_start"() <{level = 10 : i32, message = "bqk,bkd->bqd"}> : () -> ()
    %cst_23 = arith.constant dense<0.000000e+00> : vector<2x16x32xf32>
    %59 = tpu.matmul %58, %44, %cst_23 {dimension_numbers = #tpu.dot_dimension_numbers<[2], [1], [1], [2], [0, 0, 0, 1, 1, 2], [0], [0]>} : vector<2x16x16xbf16>, vector<2x16x32xbf16>, vector<2x16x32xf32> -> vector<2x16x32xf32>
    "tpu.trace_stop"() : () -> ()
    %60 = vector.shape_cast %59 : vector<2x16x32xf32> to vector<32x32xf32>
    %c0_24 = arith.constant 0 : index
    %c0_25 = arith.constant 0 : index
    %61 = vector.load %arg19[%c0_24, %c0_25] : memref<32x128xf32, #tpu.memory_space<vmem>>, vector<32x32xf32>
    tpu.vector_store %arg19[%c0_24, %c0_25], %60 {strides = array<i32>} : memref<32x128xf32, #tpu.memory_space<vmem>>, vector<32x32xf32>,
    %62 = vector.extract_strided_slice %38 {offsets = [0, 32], sizes = [32, 32], strides = [1, 1]} : vector<32x384xbf16> to vector<32x32xbf16>
    %63 = vector.shape_cast %62 : vector<32x32xbf16> to vector<2x16x32xbf16>
    %64 = vector.extract_strided_slice %38 {offsets = [0, 160], sizes = [32, 32], strides = [1, 1]} : vector<32x384xbf16> to vector<32x32xbf16>
    %65 = vector.shape_cast %64 : vector<32x32xbf16> to vector<2x16x32xbf16>
    %66 = vector.extract_strided_slice %38 {offsets = [0, 288], sizes = [32, 32], strides = [1, 1]} : vector<32x384xbf16> to vector<32x32xbf16>
    %67 = vector.shape_cast %66 : vector<32x32xbf16> to vector<2x16x32xbf16>
    "tpu.trace_start"() <{level = 10 : i32, message = "bqd,bkd->bqk"}> : () -> ()
    %cst_26 = arith.constant dense<0.000000e+00> : vector<2x16x16xf32>
    %68 = tpu.matmul %63, %65, %cst_26 {dimension_numbers = #tpu.dot_dimension_numbers<[2], [2], [1], [1], [0, 0, 0, 1, 1, 1], [0], [0]>} : vector<2x16x32xbf16>, vector<2x16x32xbf16>, vector<2x16x16xf32> -> vector<2x16x16xf32>
    "tpu.trace_stop"() : () -> ()
    %cst_27 = arith.constant 0.176776692 : f32
    %69 = vector.broadcast %cst_27 : f32 to vector<2x16x16xf32>
    %70 = arith.mulf %68, %69 : vector<2x16x16xf32>
    %cst_28 = arith.constant dense<0xFF800000> : vector<2x16xf32>
    %71 = vector.multi_reduction <maximumf>, %70, %cst_28 [2] : vector<2x16x16xf32> to vector<2x16xf32>
    %72 = vector.shape_cast %71 : vector<2x16xf32> to vector<2x16x1xf32>
    %73 = vector.broadcast %72 : vector<2x16x1xf32> to vector<2x16x16xf32>
    %74 = arith.subf %70, %73 : vector<2x16x16xf32>
    %75 = math.exp %74 : vector<2x16x16xf32>
    %cst_29 = arith.constant dense<0.000000e+00> : vector<2x16xf32>
    %76 = vector.multi_reduction <add>, %75, %cst_29 [2] : vector<2x16x16xf32> to vector<2x16xf32>
    %77 = vector.shape_cast %76 : vector<2x16xf32> to vector<2x16x1xf32>
    %78 = tpu.reciprocal %77 {approx = true} : vector<2x16x1xf32> -> vector<2x16x1xf32>
    %79 = vector.broadcast %78 : vector<2x16x1xf32> to vector<2x16x16xf32>
    %80 = arith.mulf %75, %79 : vector<2x16x16xf32>
    %81 = arith.truncf %80 : vector<2x16x16xf32> to vector<2x16x16xbf16>
    "tpu.trace_start"() <{level = 10 : i32, message = "bqk,bkd->bqd"}> : () -> ()
    %cst_30 = arith.constant dense<0.000000e+00> : vector<2x16x32xf32>
    %82 = tpu.matmul %81, %67, %cst_30 {dimension_numbers = #tpu.dot_dimension_numbers<[2], [1], [1], [2], [0, 0, 0, 1, 1, 2], [0], [0]>} : vector<2x16x16xbf16>, vector<2x16x32xbf16>, vector<2x16x32xf32> -> vector<2x16x32xf32>
    "tpu.trace_stop"() : () -> ()
    %83 = vector.shape_cast %82 : vector<2x16x32xf32> to vector<32x32xf32>
    %c0_31 = arith.constant 0 : index
    %c32 = arith.constant 32 : index
    %84 = vector.load %arg19[%c0_31, %c32] : memref<32x128xf32, #tpu.memory_space<vmem>>, vector<32x32xf32>
    tpu.vector_store %arg19[%c0_31, %c32], %83 {strides = array<i32>} : memref<32x128xf32, #tpu.memory_space<vmem>>, vector<32x32xf32>,
    %85 = vector.extract_strided_slice %38 {offsets = [0, 64], sizes = [32, 32], strides = [1, 1]} : vector<32x384xbf16> to vector<32x32xbf16>
    %86 = vector.shape_cast %85 : vector<32x32xbf16> to vector<2x16x32xbf16>
    %87 = vector.extract_strided_slice %38 {offsets = [0, 192], sizes = [32, 32], strides = [1, 1]} : vector<32x384xbf16> to vector<32x32xbf16>
    %88 = vector.shape_cast %87 : vector<32x32xbf16> to vector<2x16x32xbf16>
    %89 = vector.extract_strided_slice %38 {offsets = [0, 320], sizes = [32, 32], strides = [1, 1]} : vector<32x384xbf16> to vector<32x32xbf16>
    %90 = vector.shape_cast %89 : vector<32x32xbf16> to vector<2x16x32xbf16>
    "tpu.trace_start"() <{level = 10 : i32, message = "bqd,bkd->bqk"}> : () -> ()
    %cst_32 = arith.constant dense<0.000000e+00> : vector<2x16x16xf32>
    %91 = tpu.matmul %86, %88, %cst_32 {dimension_numbers = #tpu.dot_dimension_numbers<[2], [2], [1], [1], [0, 0, 0, 1, 1, 1], [0], [0]>} : vector<2x16x32xbf16>, vector<2x16x32xbf16>, vector<2x16x16xf32> -> vector<2x16x16xf32>
    "tpu.trace_stop"() : () -> ()
    %cst_33 = arith.constant 0.176776692 : f32
    %92 = vector.broadcast %cst_33 : f32 to vector<2x16x16xf32>
    %93 = arith.mulf %91, %92 : vector<2x16x16xf32>
    %cst_34 = arith.constant dense<0xFF800000> : vector<2x16xf32>
    %94 = vector.multi_reduction <maximumf>, %93, %cst_34 [2] : vector<2x16x16xf32> to vector<2x16xf32>
    %95 = vector.shape_cast %94 : vector<2x16xf32> to vector<2x16x1xf32>
    %96 = vector.broadcast %95 : vector<2x16x1xf32> to vector<2x16x16xf32>
    %97 = arith.subf %93, %96 : vector<2x16x16xf32>
    %98 = math.exp %97 : vector<2x16x16xf32>
    %cst_35 = arith.constant dense<0.000000e+00> : vector<2x16xf32>
    %99 = vector.multi_reduction <add>, %98, %cst_35 [2] : vector<2x16x16xf32> to vector<2x16xf32>
    %100 = vector.shape_cast %99 : vector<2x16xf32> to vector<2x16x1xf32>
    %101 = tpu.reciprocal %100 {approx = true} : vector<2x16x1xf32> -> vector<2x16x1xf32>
    %102 = vector.broadcast %101 : vector<2x16x1xf32> to vector<2x16x16xf32>
    %103 = arith.mulf %98, %102 : vector<2x16x16xf32>
    %104 = arith.truncf %103 : vector<2x16x16xf32> to vector<2x16x16xbf16>
    "tpu.trace_start"() <{level = 10 : i32, message = "bqk,bkd->bqd"}> : () -> ()
    %cst_36 = arith.constant dense<0.000000e+00> : vector<2x16x32xf32>
    %105 = tpu.matmul %104, %90, %cst_36 {dimension_numbers = #tpu.dot_dimension_numbers<[2], [1], [1], [2], [0, 0, 0, 1, 1, 2], [0], [0]>} : vector<2x16x16xbf16>, vector<2x16x32xbf16>, vector<2x16x32xf32> -> vector<2x16x32xf32>
    "tpu.trace_stop"() : () -> ()
    %106 = vector.shape_cast %105 : vector<2x16x32xf32> to vector<32x32xf32>
    %c0_37 = arith.constant 0 : index
    %c64 = arith.constant 64 : index
    %107 = vector.load %arg19[%c0_37, %c64] : memref<32x128xf32, #tpu.memory_space<vmem>>, vector<32x32xf32>
    tpu.vector_store %arg19[%c0_37, %c64], %106 {strides = array<i32>} : memref<32x128xf32, #tpu.memory_space<vmem>>, vector<32x32xf32>,
    %108 = vector.extract_strided_slice %38 {offsets = [0, 96], sizes = [32, 32], strides = [1, 1]} : vector<32x384xbf16> to vector<32x32xbf16>
    %109 = vector.shape_cast %108 : vector<32x32xbf16> to vector<2x16x32xbf16>
    %110 = vector.extract_strided_slice %38 {offsets = [0, 224], sizes = [32, 32], strides = [1, 1]} : vector<32x384xbf16> to vector<32x32xbf16>
    %111 = vector.shape_cast %110 : vector<32x32xbf16> to vector<2x16x32xbf16>
    %112 = vector.extract_strided_slice %38 {offsets = [0, 352], sizes = [32, 32], strides = [1, 1]} : vector<32x384xbf16> to vector<32x32xbf16>
    %113 = vector.shape_cast %112 : vector<32x32xbf16> to vector<2x16x32xbf16>
    "tpu.trace_start"() <{level = 10 : i32, message = "bqd,bkd->bqk"}> : () -> ()
    %cst_38 = arith.constant dense<0.000000e+00> : vector<2x16x16xf32>
    %114 = tpu.matmul %109, %111, %cst_38 {dimension_numbers = #tpu.dot_dimension_numbers<[2], [2], [1], [1], [0, 0, 0, 1, 1, 1], [0], [0]>} : vector<2x16x32xbf16>, vector<2x16x32xbf16>, vector<2x16x16xf32> -> vector<2x16x16xf32>
    "tpu.trace_stop"() : () -> ()
    %cst_39 = arith.constant 0.176776692 : f32
    %115 = vector.broadcast %cst_39 : f32 to vector<2x16x16xf32>
    %116 = arith.mulf %114, %115 : vector<2x16x16xf32>
    %cst_40 = arith.constant dense<0xFF800000> : vector<2x16xf32>
    %117 = vector.multi_reduction <maximumf>, %116, %cst_40 [2] : vector<2x16x16xf32> to vector<2x16xf32>
    %118 = vector.shape_cast %117 : vector<2x16xf32> to vector<2x16x1xf32>
    %119 = vector.broadcast %118 : vector<2x16x1xf32> to vector<2x16x16xf32>
    %120 = arith.subf %116, %119 : vector<2x16x16xf32>
    %121 = math.exp %120 : vector<2x16x16xf32>
    %cst_41 = arith.constant dense<0.000000e+00> : vector<2x16xf32>
    %122 = vector.multi_reduction <add>, %121, %cst_41 [2] : vector<2x16x16xf32> to vector<2x16xf32>
    %123 = vector.shape_cast %122 : vector<2x16xf32> to vector<2x16x1xf32>
    %124 = tpu.reciprocal %123 {approx = true} : vector<2x16x1xf32> -> vector<2x16x1xf32>
    %125 = vector.broadcast %124 : vector<2x16x1xf32> to vector<2x16x16xf32>
    %126 = arith.mulf %121, %125 : vector<2x16x16xf32>
    %127 = arith.truncf %126 : vector<2x16x16xf32> to vector<2x16x16xbf16>
    "tpu.trace_start"() <{level = 10 : i32, message = "bqk,bkd->bqd"}> : () -> ()
    %cst_42 = arith.constant dense<0.000000e+00> : vector<2x16x32xf32>
    %128 = tpu.matmul %127, %113, %cst_42 {dimension_numbers = #tpu.dot_dimension_numbers<[2], [1], [1], [2], [0, 0, 0, 1, 1, 2], [0], [0]>} : vector<2x16x16xbf16>, vector<2x16x32xbf16>, vector<2x16x32xf32> -> vector<2x16x32xf32>
    "tpu.trace_stop"() : () -> ()
    %129 = vector.shape_cast %128 : vector<2x16x32xf32> to vector<32x32xf32>
    %c0_43 = arith.constant 0 : index
    %c96 = arith.constant 96 : index
    %130 = vector.load %arg19[%c0_43, %c96] : memref<32x128xf32, #tpu.memory_space<vmem>>, vector<32x32xf32>
    tpu.vector_store %arg19[%c0_43, %c96], %129 {strides = array<i32>} : memref<32x128xf32, #tpu.memory_space<vmem>>, vector<32x32xf32>,
    %c0_44 = arith.constant 0 : index
    %c0_45 = arith.constant 0 : index
    %131 = vector.load %arg19[%c0_44, %c0_45] : memref<32x128xf32, #tpu.memory_space<vmem>>, vector<32x128xf32>
    %132 = arith.truncf %131 : vector<32x128xf32> to vector<32x128xbf16>
    %c0_46 = arith.constant 0 : index
    %c0_47 = arith.constant 0 : index
    %c0_48 = arith.constant 0 : index
    %133 = vector.load %arg7[%c0_46, %c0_47, %c0_48] : memref<1x128x128xbf16, #tpu.memory_space<vmem>>, vector<1x128x128xbf16>
    %134 = vector.shape_cast %133 : vector<1x128x128xbf16> to vector<128x128xbf16>
    %cst_49 = arith.constant dense<0.000000e+00> : vector<32x128xf32>
    %135 = tpu.matmul %132, %134, %cst_49 {dimension_numbers = #tpu.dot_dimension_numbers<[1], [0], [0], [1], [0, 0, 1, 1], [], []>} : vector<32x128xbf16>, vector<128x128xbf16>, vector<32x128xf32> -> vector<32x128xf32>
    %c0_50 = arith.constant 0 : index
    %c0_51 = arith.constant 0 : index
    %c0_52 = arith.constant 0 : index
    %136 = vector.load %arg8[%c0_50, %c0_51, %c0_52] : memref<1x1x128xf32, #tpu.memory_space<vmem>>, vector<1x1x128xf32>
    %137 = vector.shape_cast %136 : vector<1x1x128xf32> to vector<1x128xf32>
    %138 = vector.broadcast %137 : vector<1x128xf32> to vector<32x128xf32>
    %139 = arith.addf %135, %138 : vector<32x128xf32>
    %140 = arith.addf %3, %139 : vector<32x128xf32>
    %c0_53 = arith.constant 0 : index
    %c0_54 = arith.constant 0 : index
    %c0_55 = arith.constant 0 : index
    %141 = vector.load %arg9[%c0_53, %c0_54, %c0_55] : memref<1x1x128xf32, #tpu.memory_space<vmem>>, vector<1x1x128xf32>
    %142 = vector.shape_cast %141 : vector<1x1x128xf32> to vector<1x128xf32>
    %c0_56 = arith.constant 0 : index
    %c0_57 = arith.constant 0 : index
    %c0_58 = arith.constant 0 : index
    %143 = vector.load %arg10[%c0_56, %c0_57, %c0_58] : memref<1x1x128xf32, #tpu.memory_space<vmem>>, vector<1x1x128xf32>
    %144 = vector.shape_cast %143 : vector<1x1x128xf32> to vector<1x128xf32>
    %cst_59 = arith.constant dense<0.000000e+00> : vector<32xf32>
    %145 = vector.multi_reduction <add>, %140, %cst_59 [1] : vector<32x128xf32> to vector<32xf32>
    %146 = vector.shape_cast %145 : vector<32xf32> to vector<32x1xf32>
    %cst_60 = arith.constant 1.280000e+02 : f32
    %147 = vector.broadcast %cst_60 : f32 to vector<32x1xf32>
    %148 = arith.divf %146, %147 : vector<32x1xf32>
    %149 = vector.broadcast %148 : vector<32x1xf32> to vector<32x128xf32>
    %150 = arith.subf %140, %149 : vector<32x128xf32>
    %151 = arith.mulf %150, %150 : vector<32x128xf32>
    %cst_61 = arith.constant dense<0.000000e+00> : vector<32xf32>
    %152 = vector.multi_reduction <add>, %151, %cst_61 [1] : vector<32x128xf32> to vector<32xf32>
    %153 = vector.shape_cast %152 : vector<32xf32> to vector<32x1xf32>
    %cst_62 = arith.constant 1.280000e+02 : f32
    %154 = vector.broadcast %cst_62 : f32 to vector<32x1xf32>
    %155 = arith.divf %153, %154 : vector<32x1xf32>
    %156 = vector.broadcast %148 : vector<32x1xf32> to vector<32x128xf32>
    %157 = arith.subf %140, %156 : vector<32x128xf32>
    %cst_63 = arith.constant 2.000000e-06 : f32
    %158 = vector.broadcast %cst_63 : f32 to vector<32x1xf32>
    %159 = arith.addf %155, %158 : vector<32x1xf32>
    %160 = math.rsqrt %159 : vector<32x1xf32>
    %161 = vector.broadcast %160 : vector<32x1xf32> to vector<32x128xf32>
    %162 = arith.mulf %157, %161 : vector<32x128xf32>
    %163 = vector.broadcast %142 : vector<1x128xf32> to vector<32x128xf32>
    %164 = arith.mulf %162, %163 : vector<32x128xf32>
    %165 = vector.broadcast %144 : vector<1x128xf32> to vector<32x128xf32>
    %166 = arith.addf %164, %165 : vector<32x128xf32>
    %167 = arith.truncf %166 : vector<32x128xf32> to vector<32x128xbf16>
    %c0_64 = arith.constant 0 : index
    %c0_65 = arith.constant 0 : index
    %c0_66 = arith.constant 0 : index
    %168 = vector.load %arg11[%c0_64, %c0_65, %c0_66] : memref<1x128x256xbf16, #tpu.memory_space<vmem>>, vector<1x128x256xbf16>
    %169 = vector.shape_cast %168 : vector<1x128x256xbf16> to vector<128x256xbf16>
    %cst_67 = arith.constant dense<0.000000e+00> : vector<32x256xf32>
    %170 = tpu.matmul %167, %169, %cst_67 {dimension_numbers = #tpu.dot_dimension_numbers<[1], [0], [0], [1], [0, 0, 1, 1], [], []>} : vector<32x128xbf16>, vector<128x256xbf16>, vector<32x256xf32> -> vector<32x256xf32>
    %c0_68 = arith.constant 0 : index
    %c0_69 = arith.constant 0 : index
    %c0_70 = arith.constant 0 : index
    %171 = vector.load %arg12[%c0_68, %c0_69, %c0_70] : memref<1x1x256xf32, #tpu.memory_space<vmem>>, vector<1x1x256xf32>
    %172 = vector.shape_cast %171 : vector<1x1x256xf32> to vector<1x256xf32>
    %173 = vector.broadcast %172 : vector<1x256xf32> to vector<32x256xf32>
    %174 = arith.addf %170, %173 : vector<32x256xf32>
    %cst_71 = arith.constant 0.636619746 : f32
    %175 = math.sqrt %cst_71 : f32
    %cst_72 = arith.constant 5.000000e-01 : f32
    %176 = vector.broadcast %cst_72 : f32 to vector<32x256xf32>
    %177 = arith.mulf %176, %174 : vector<32x256xf32>
    %cst_73 = arith.constant 4.471500e-02 : f32
    %178 = vector.broadcast %cst_73 : f32 to vector<32x256xf32>
    %179 = arith.mulf %178, %174 : vector<32x256xf32>
    %180 = arith.mulf %179, %174 : vector<32x256xf32>
    %181 = arith.mulf %180, %174 : vector<32x256xf32>
    %182 = arith.addf %174, %181 : vector<32x256xf32>
    %183 = vector.broadcast %175 : f32 to vector<32x256xf32>
    %184 = arith.mulf %183, %182 : vector<32x256xf32>
    %185 = math.tanh %184 : vector<32x256xf32>
    %cst_74 = arith.constant 1.000000e+00 : f32
    %186 = vector.broadcast %cst_74 : f32 to vector<32x256xf32>
    %187 = arith.addf %186, %185 : vector<32x256xf32>
    %188 = arith.mulf %177, %187 : vector<32x256xf32>
    %189 = arith.truncf %188 : vector<32x256xf32> to vector<32x256xbf16>
    %c0_75 = arith.constant 0 : index
    %c0_76 = arith.constant 0 : index
    %c0_77 = arith.constant 0 : index
    %190 = vector.load %arg13[%c0_75, %c0_76, %c0_77] : memref<1x256x128xbf16, #tpu.memory_space<vmem>>, vector<1x256x128xbf16>
    %191 = vector.shape_cast %190 : vector<1x256x128xbf16> to vector<256x128xbf16>
    %cst_78 = arith.constant dense<0.000000e+00> : vector<32x128xf32>
    %192 = tpu.matmul %189, %191, %cst_78 {dimension_numbers = #tpu.dot_dimension_numbers<[1], [0], [0], [1], [0, 0, 1, 1], [], []>} : vector<32x256xbf16>, vector<256x128xbf16>, vector<32x128xf32> -> vector<32x128xf32>
    %c0_79 = arith.constant 0 : index
    %c0_80 = arith.constant 0 : index
    %c0_81 = arith.constant 0 : index
    %193 = vector.load %arg14[%c0_79, %c0_80, %c0_81] : memref<1x1x128xf32, #tpu.memory_space<vmem>>, vector<1x1x128xf32>
    %194 = vector.shape_cast %193 : vector<1x1x128xf32> to vector<1x128xf32>
    %195 = vector.broadcast %194 : vector<1x128xf32> to vector<32x128xf32>
    %196 = arith.addf %192, %195 : vector<32x128xf32>
    %197 = arith.addf %140, %196 : vector<32x128xf32>
    %c0_82 = arith.constant 0 : index
    %c0_83 = arith.constant 0 : index
    %198 = vector.load %arg18[%c0_82, %c0_83] : memref<32x128xf32, #tpu.memory_space<vmem>>, vector<32x128xf32>
    tpu.vector_store %arg18[%c0_82, %c0_83], %197 {strides = array<i32>} : memref<32x128xf32, #tpu.memory_space<vmem>>, vector<32x128xf32>,
    %c1_i32 = arith.constant 1 : i32
    %199 = arith.cmpi eq, %arg1, %c1_i32 : i32
    %200 = arith.extui %199 : i1 to i32
    %c0_i32_84 = arith.constant 0 : i32
    %201 = arith.cmpi ne, %200, %c0_i32_84 : i32
    scf.if %201 {
      %c0_85 = arith.constant 0 : index
      %c0_86 = arith.constant 0 : index
      %202 = vector.load %arg15[%c0_85, %c0_86] : memref<1x128xf32, #tpu.memory_space<vmem>>, vector<1x128xf32>
      %c0_87 = arith.constant 0 : index
      %c0_88 = arith.constant 0 : index
      %203 = vector.load %arg16[%c0_87, %c0_88] : memref<1x128xf32, #tpu.memory_space<vmem>>, vector<1x128xf32>
      %cst_89 = arith.constant dense<0.000000e+00> : vector<32xf32>
      %204 = vector.multi_reduction <add>, %197, %cst_89 [1] : vector<32x128xf32> to vector<32xf32>
      %205 = vector.shape_cast %204 : vector<32xf32> to vector<32x1xf32>
      %cst_90 = arith.constant 1.280000e+02 : f32
      %206 = vector.broadcast %cst_90 : f32 to vector<32x1xf32>
      %207 = arith.divf %205, %206 : vector<32x1xf32>
      %208 = vector.broadcast %207 : vector<32x1xf32> to vector<32x128xf32>
      %209 = arith.subf %197, %208 : vector<32x128xf32>
      %210 = arith.mulf %209, %209 : vector<32x128xf32>
      %cst_91 = arith.constant dense<0.000000e+00> : vector<32xf32>
      %211 = vector.multi_reduction <add>, %210, %cst_91 [1] : vector<32x128xf32> to vector<32xf32>
      %212 = vector.shape_cast %211 : vector<32xf32> to vector<32x1xf32>
      %cst_92 = arith.constant 1.280000e+02 : f32
      %213 = vector.broadcast %cst_92 : f32 to vector<32x1xf32>
      %214 = arith.divf %212, %213 : vector<32x1xf32>
      %215 = vector.broadcast %207 : vector<32x1xf32> to vector<32x128xf32>
      %216 = arith.subf %197, %215 : vector<32x128xf32>
      %cst_93 = arith.constant 2.000000e-06 : f32
      %217 = vector.broadcast %cst_93 : f32 to vector<32x1xf32>
      %218 = arith.addf %214, %217 : vector<32x1xf32>
      %219 = math.rsqrt %218 : vector<32x1xf32>
      %220 = vector.broadcast %219 : vector<32x1xf32> to vector<32x128xf32>
      %221 = arith.mulf %216, %220 : vector<32x128xf32>
      %222 = vector.broadcast %202 : vector<1x128xf32> to vector<32x128xf32>
      %223 = arith.mulf %221, %222 : vector<32x128xf32>
      %224 = vector.broadcast %203 : vector<1x128xf32> to vector<32x128xf32>
      %225 = arith.addf %223, %224 : vector<32x128xf32>
      %c0_94 = arith.constant 0 : index
      %c0_95 = arith.constant 0 : index
      %226 = vector.load %arg17[%c0_94, %c0_95] : memref<32x128xf32, #tpu.memory_space<vmem>>, vector<32x128xf32>
      tpu.vector_store %arg17[%c0_94, %c0_95], %225 {strides = array<i32>} : memref<32x128xf32, #tpu.memory_space<vmem>>, vector<32x128xf32>,
    } else {
    }
    return
  }
  func.func @transform_0(%arg0: i32, %arg1: i32) -> (i32, i32) {
    %c0_i32 = arith.constant 0 : i32
    %c0_i32_0 = arith.constant 0 : i32
    return %arg0, %c0_i32 : i32, i32
  }
  func.func @transform_1(%arg0: i32, %arg1: i32) -> (i32, i32, i32) {
    %c0_i32 = arith.constant 0 : i32
    %c0_i32_0 = arith.constant 0 : i32
    %c0_i32_1 = arith.constant 0 : i32
    return %arg1, %c0_i32, %c0_i32_0 : i32, i32, i32
  }
  func.func @transform_2(%arg0: i32, %arg1: i32) -> (i32, i32, i32) {
    %c0_i32 = arith.constant 0 : i32
    %c0_i32_0 = arith.constant 0 : i32
    %c0_i32_1 = arith.constant 0 : i32
    return %arg1, %c0_i32, %c0_i32_0 : i32, i32, i32
  }
  func.func @transform_3(%arg0: i32, %arg1: i32) -> (i32, i32, i32) {
    %c0_i32 = arith.constant 0 : i32
    %c0_i32_0 = arith.constant 0 : i32
    %c0_i32_1 = arith.constant 0 : i32
    return %arg1, %c0_i32, %c0_i32_0 : i32, i32, i32
  }
  func.func @transform_4(%arg0: i32, %arg1: i32) -> (i32, i32, i32) {
    %c0_i32 = arith.constant 0 : i32
    %c0_i32_0 = arith.constant 0 : i32
    %c0_i32_1 = arith.constant 0 : i32
    return %arg1, %c0_i32, %c0_i32_0 : i32, i32, i32
  }
  func.func @transform_5(%arg0: i32, %arg1: i32) -> (i32, i32, i32) {
    %c0_i32 = arith.constant 0 : i32
    %c0_i32_0 = arith.constant 0 : i32
    %c0_i32_1 = arith.constant 0 : i32
    return %arg1, %c0_i32, %c0_i32_0 : i32, i32, i32
  }
  func.func @transform_6(%arg0: i32, %arg1: i32) -> (i32, i32, i32) {
    %c0_i32 = arith.constant 0 : i32
    %c0_i32_0 = arith.constant 0 : i32
    %c0_i32_1 = arith.constant 0 : i32
    return %arg1, %c0_i32, %c0_i32_0 : i32, i32, i32
  }
  func.func @transform_7(%arg0: i32, %arg1: i32) -> (i32, i32, i32) {
    %c0_i32 = arith.constant 0 : i32
    %c0_i32_0 = arith.constant 0 : i32
    %c0_i32_1 = arith.constant 0 : i32
    return %arg1, %c0_i32, %c0_i32_0 : i32, i32, i32
  }
  func.func @transform_8(%arg0: i32, %arg1: i32) -> (i32, i32, i32) {
    %c0_i32 = arith.constant 0 : i32
    %c0_i32_0 = arith.constant 0 : i32
    %c0_i32_1 = arith.constant 0 : i32
    return %arg1, %c0_i32, %c0_i32_0 : i32, i32, i32
  }
  func.func @transform_9(%arg0: i32, %arg1: i32) -> (i32, i32, i32) {
    %c0_i32 = arith.constant 0 : i32
    %c0_i32_0 = arith.constant 0 : i32
    %c0_i32_1 = arith.constant 0 : i32
    return %arg1, %c0_i32, %c0_i32_0 : i32, i32, i32
  }
  func.func @transform_10(%arg0: i32, %arg1: i32) -> (i32, i32, i32) {
    %c0_i32 = arith.constant 0 : i32
    %c0_i32_0 = arith.constant 0 : i32
    %c0_i32_1 = arith.constant 0 : i32
    return %arg1, %c0_i32, %c0_i32_0 : i32, i32, i32
  }
  func.func @transform_11(%arg0: i32, %arg1: i32) -> (i32, i32, i32) {
    %c0_i32 = arith.constant 0 : i32
    %c0_i32_0 = arith.constant 0 : i32
    %c0_i32_1 = arith.constant 0 : i32
    return %arg1, %c0_i32, %c0_i32_0 : i32, i32, i32
  }
  func.func @transform_12(%arg0: i32, %arg1: i32) -> (i32, i32, i32) {
    %c0_i32 = arith.constant 0 : i32
    %c0_i32_0 = arith.constant 0 : i32
    %c0_i32_1 = arith.constant 0 : i32
    return %arg1, %c0_i32, %c0_i32_0 : i32, i32, i32
  }
  func.func @transform_13(%arg0: i32, %arg1: i32) -> (i32, i32) {
    %c0_i32 = arith.constant 0 : i32
    %c0_i32_0 = arith.constant 0 : i32
    %c0_i32_1 = arith.constant 0 : i32
    return %c0_i32, %c0_i32_0 : i32, i32
  }
  func.func @transform_14(%arg0: i32, %arg1: i32) -> (i32, i32) {
    %c0_i32 = arith.constant 0 : i32
    %c0_i32_0 = arith.constant 0 : i32
    %c0_i32_1 = arith.constant 0 : i32
    return %c0_i32, %c0_i32_0 : i32, i32
  }
  func.func @transform_15(%arg0: i32, %arg1: i32) -> (i32, i32) {
    %c0_i32 = arith.constant 0 : i32
    %c0_i32_0 = arith.constant 0 : i32
    return %arg0, %c0_i32 : i32, i32
  }
}

</mosaic_0001>

<bundles_post_ra>
// kernel: _lambda_.2
= control target key start
LH: loop header
LB: loop body
LE: loop exit
PB: predicated region body
PF: predicated region fallthrough
CT: control target
= control target key end

     0   :  { %s513_s15 = smov 0   ;;  %s582_s0 = inlined_call_operand.vmem [shape: bf16[32,192], index: 0, kind: input, shape index: {}]   ;;  %s583_s1 = inlined_call_operand.vmem [shape: bf16[192,128], index: 1, kind: input, shape index: {}]   ;;  %s584_s2 = inlined_call_operand.vmem [shape: f32[1,128], index: 2, kind: input, shape index: {}]   ;;  %s585_s3 = inlined_call_operand.vmem [shape: f32[16,128], index: 3, kind: input, shape index: {}]   ;;  %s586_s4 = inlined_call_operand.vmem [shape: f32[32,128], index: 4, kind: output, shape index: {}]  }
   0x1 LB: > { %s426_s16 = sadd.s32 4294967295, %s485_s15   ;;  %p430_p0 = scmp.ge.s32.totalorder %s485_s15, 1  ;;  %s485_s15 = sphi %s513_s15, %s14_s15  }
   0x2   : > { %p164_p1 = scmp.lt.s32.totalorder %s485_s15, 3 }
   0x4   : > { %p165_p2 = pnand %p430_p0, %p164_p1 }
   0x5   : > { %v464_v0 = vld [vmem:[%s583_s1] sm:$0xff] (!%p165_p2)   ;;  %v487_v1 = vmov (!%p165_p2), 0   ;;  %s431_s19 = sshll.u32 (!%p165_p2), %s426_s16, 1  ;;  %v465_v2 = vld [vmem:[%s583_s1 + $0x8] sm:$0xff] (!%p165_p2)   ;;  %v466_v3 = vld [vmem:[%s583_s1 + $0x10] sm:$0xff] (!%p165_p2)   ;;  %vm319_vm0 = vcmask (!%p165_p2), 523264  }
   0x6   : > { %168 = sbr.rel (%p165_p2) target bundleno = 273 (0x111), region = 36  ;;  %323 = vmatprep.subr.bf16.mxu0 (!%p165_p2), %v487_v1  ;;  %p192_p3 = scmp.lt.s32.totalorder (!%p165_p2), %s431_s19, 3  ;;  %v467_v4 = vld [vmem:[%s583_s1 + $0x18] sm:$0xff] (!%p165_p2)   ;;  %v468_v6 = vld [vmem:[%s583_s1 + $0x20] sm:$0xff] (!%p165_p2)   ;;  %v469_v7 = vld [vmem:[%s583_s1 + $0x28] sm:$0xff] (!%p165_p2)  }
   0x7   : > { %324 = vmatpush1.bf16.msra.mxu0 (!%p165_p2), %v464_v0  ;;  %v470_v8 = vld [vmem:[%s583_s1 + $0x30] sm:$0xff] (!%p165_p2)   ;;  %v471_v9 = vld [vmem:[%s583_s1 + $0x38] sm:$0xff] (!%p165_p2)   ;;  %v472_v10 = vld [vmem:[%s583_s1 + $0x40] sm:$0xff] (!%p165_p2)  }
   0x8   : > { %325 = vmatprep.subr.bf16.mxu0 (!%p165_p2), %v487_v1  ;;  %v473_v11 = vld [vmem:[%s583_s1 + $0x48] sm:$0xff] (!%p165_p2)   ;;  %v474_v12 = vld [vmem:[%s583_s1 + $0x50] sm:$0xff] (!%p165_p2)   ;;  %v475_v13 = vld [vmem:[%s583_s1 + $0x58] sm:$0xff] (!%p165_p2)  }
   0x9   : > { %v436_v15 = vld [vmem:[%s584_s2] ss:$0 sm:$0xff] (!%p165_p2)  ;;  %v365_v21 = vld [vmem:[%s585_s3 + $0x8] sm:$0xff] (!%p165_p2) }
   0xa   : > { %v364_v17 = vld [vmem:[%s585_s3] sm:$0xff] (!%p165_p2) }
   0xb   : > { %326 = vmatpush1.bf16.msra.mxu0 (!%p165_p2), %v465_v2 }
   0xc   : > { %327 = vmatprep.subr.bf16.mxu0 (!%p165_p2), %v487_v1 }
   0xd   : > { %s588_s19 = smov (!%p192_p3, %s431_s19), 3 }
   0xe   : > { %s454_s24 = sshll.u32 %s588_s19, 3 }
   0xf   : > { %328 = vmatpush1.bf16.msra.mxu0 %v466_v3  ;;  %s196_s29 = scalar_lea.vmem %s582_s0, %s454_s24  ;;  %s202_s30 = scalar_lea.vmem %s586_s4, %s454_s24 }
  0x10   : > { %329 = vmatprep.subr.bf16.mxu0 %v487_v1  ;;  %v478_v5 = vld [vmem:[%s196_s29 + $0x4] ss:$8 sps:$4 sm:$0xff]   ;;  %v476_v14 = vld [vmem:[%s196_s29] ss:$8 sps:$4 sm:$0xff]  }
  0x11   : > { %451 = vmatprep.mubr.msk.bf16.mxu0 %vm319_vm0, %v478_v5 }
  0x13   : > { %330 = vmatpush1.bf16.msra.mxu0 %v467_v4 }
  0x14   : > { %331 = vmatprep.subr.bf16.mxu0 %v487_v1 }
  0x17   : > { %332 = vmatpush1.bf16.msra.mxu0 %v468_v6 }
  0x18   : > { %333 = vmatprep.subr.bf16.mxu0 %v487_v1 }
  0x1b   : > { %334 = vmatpush1.bf16.msra.mxu0 %v469_v7 }
  0x1c   : > { %335 = vmatprep.subr.bf16.mxu0 %v487_v1 }
  0x1f   : > { %336 = vmatpush1.bf16.msra.mxu0 %v470_v8 }
  0x20   : > { %337 = vmatprep.subr.bf16.mxu0 %v487_v1 }
  0x23   : > { %338 = vmatpush1.bf16.msra.mxu0 %v471_v9 }
  0x24   : > { %339 = vmatprep.subr.bf16.mxu0 %v487_v1 }
  0x27   : > { %340 = vmatpush1.bf16.msra.mxu0 %v472_v10 }
  0x28   : > { %341 = vmatprep.subr.bf16.mxu0 %v487_v1 }
  0x2b   : > { %342 = vmatpush1.bf16.msra.mxu0 %v473_v11 }
  0x2c   : > { %343 = vmatprep.subr.bf16.mxu0 %v487_v1 }
  0x2f   : > { %344 = vmatpush1.bf16.msra.mxu0 %v474_v12 }
  0x30   : > { %345 = vmatprep.subr.bf16.mxu0 %v487_v1 }
  0x33   : > { %346 = vmatpush1.bf16.msra.mxu0 %v475_v13 }
  0x36   : > { %356 = vmatmul.mubr.bf16.vlgmr.msra.gmra.mrb[0].mxu0 %v476_v14 }
 0x109   : > { %v357_v16 = vpop.f32.mrb[0].mxu0 }
 0x10a   : > { %v358_v18 = vadd.f32 %v436_v15, %v357_v16  ;;  %v359_v19 = vpop.f32.mrb[1].mxu0 }
 0x10b   : > { %v360_v20 = vpop.f32.mrb[2].mxu0 }
 0x10c   : > { %v366_v22 = vadd.f32 %v364_v17, %v358_v18  ;;  %v361_v23 = vadd.f32 %v436_v15, %v360_v20  ;;  %v362_v24 = vpop.f32.mrb[3].mxu0 }
 0x10e   : > { %368 = vst [vmem:[%s202_s30] sm:$0xff] %v366_v22  ;;  %v367_v25 = vadd.f32 %v365_v21, %v361_v23 }
 0x110   : > { %369 = vst [vmem:[%s202_s30 + $0x8] sm:$0xff] %v367_v25 }
 0x111 PF: > { %s14_s15 = sadd.s32 1, %s485_s15  }
 0x112   : > { %p11_p4 = scmp.ge.s32.totalorder %s14_s15, 4  }
 0x114   :  { %13 = sbr.rel (!%p11_p4) target bundleno = 1 (0x1), region = 66 }

// kernel: _lambda_.3
= control target key start
LH: loop header
LB: loop body
LE: loop exit
PB: predicated region body
PF: predicated region fallthrough
CT: control target
= control target key end

     0   :  { %s4235_s0 = inlined_call_operand.vmem [shape: f32[32,128], index: 0, kind: input, shape index: {}]   ;;  %s4236_s1 = inlined_call_operand.vmem [shape: f32[2,1,128], index: 1, kind: input, shape index: {}]   ;;  %s4237_s2 = inlined_call_operand.vmem [shape: f32[2,1,128], index: 2, kind: input, shape index: {}]   ;;  %s4238_s3 = inlined_call_operand.vmem [shape: bf16[2,128,384], index: 3, kind: input, shape index: {}]   ;;  %s4239_s4 = inlined_call_operand.vmem [shape: f32[2,1,384], index: 4, kind: input, shape index: {}]   ;;  %s4240_s5 = inlined_call_operand.vmem [shape: bf16[2,128,128], index: 5, kind: input, shape index: {}]   ;;  %s4241_s6 = inlined_call_operand.vmem [shape: f32[2,1,128], index: 6, kind: input, shape index: {}]   ;;  %s4242_s7 = inlined_call_operand.vmem [shape: f32[2,1,128], index: 7, kind: input, shape index: {}]   ;;  %s4243_s8 = inlined_call_operand.vmem [shape: f32[2,1,128], index: 8, kind: input, shape index: {}]   ;;  %s4244_s9 = inlined_call_operand.vmem [shape: bf16[2,128,256], index: 9, kind: input, shape index: {}]   ;;  %s4245_s10 = inlined_call_operand.vmem [shape: f32[2,1,256], index: 10, kind: input, shape index: {}]   ;;  %s4246_s11 = inlined_call_operand.vmem [shape: bf16[2,256,128], index: 11, kind: input, shape index: {}]   ;;  %s4247_s12 = inlined_call_operand.vmem [shape: f32[2,1,128], index: 12, kind: input, shape index: {}]   ;;  %s4248_s13 = inlined_call_operand.vmem [shape: f32[1,128], index: 13, kind: input, shape index: {}]   ;;  %s4249_s14 = inlined_call_operand.vmem [shape: f32[1,128], index: 14, kind: input, shape index: {}]   ;;  %s4250_s15 = inlined_call_operand.hbm [shape: f32[32,128], index: 15, kind: output, shape index: {}]  }
   0x1   :  { %4254 = sst [smem:[#allocation10_spill]] %s4237_s2 }
   0x2   :  { %4255 = sst [smem:[#allocation11_spill]] %s4238_s3 }
   0x3   :  { %4256 = sst [smem:[#allocation12_spill]] %s4240_s5 }
   0x4   :  { %4257 = sst [smem:[#allocation13_spill]] %s4248_s13 }
   0x5   :  { %4258 = sst [smem:[#allocation14_spill]] %s4249_s14 }
   0x6   :  { %4259 = sst [smem:[#allocation15_spill]] %s4250_s15 }
   0x7   :  { %20 = vsyncpa [#allocation5], 0  ;;  %s3705_s18 = smov 0   ;;  %s3707_s19 = smov 0  }
   0x8   :  { %s3709_s20 = smov 0  }
   0x9 LB: > { %4260 = sst [smem:[#allocation7_spill]] %s3610_s19  ;;  %s35_s22 = sadd.s32 1, %s3610_s19  ;;  %s3614_s20 = sphi %s3709_s20, %s26_s20   ;;  %s3610_s19 = sphi %s3707_s19, %s4279_s19   ;;  %s3606_s18 = sphi %s3705_s18, %s4278_s18  }
   0xa   : > { %4261 = sst [smem:[#allocation8_spill]] %s3614_s20  ;;  %p36_p0 = scmp.ge.s32.totalorder %s35_s22, 2 }
   0xb   : > { %p3011_p1 = scmp.ge.s32.totalorder %s3614_s20, 1  ;;  %p557_p2 = scmp.lt.s32.totalorder %s3614_s20, 3 }
   0xc   : > { %s4281_s22 = smov (%p36_p0, %s35_s22), 0 }
   0xd   : > { %4262 = sst [smem:[#allocation9_spill]] %s4281_s22  ;;  %p558_p3 = pnand %p3011_p1, %p557_p2 }
   0xe   : > { %p652_p4 = scmp.lt.s32.totalorder (!%p558_p3), %s3606_s18, 1  ;;  %s4264_s5 = sld [smem:[#allocation12_spill]] (!%p558_p3) }
   0xf   : > { %561 = sbr.rel (%p558_p3) target bundleno = 4536 (0x11b8), region = 80  ;;  %s4265_s3 = sld [smem:[#allocation11_spill]] (!%p558_p3) }
  0x10   : > { %p3020_p5 = scmp.ne.s32.totalorder (!%p558_p3), %s3606_s18, 0 }
  0x16   : > { %s3728_s23 = scalar_select %p652_p4, %s3606_s18, 1 }
  0x17   : > { %v704_v0 = vld [vmem:[%s4235_s0] sm:$0xff] (!%p3020_p5)  ;;  %v705_v1 = vld [vmem:[%s4235_s0 + $0x8] sm:$0xff] (!%p3020_p5)  ;;  %v706_v2 = vld [vmem:[%s4235_s0 + $0x10] sm:$0xff] (!%p3020_p5) }
  0x18   : > { %s3333_s30 = smul.u32 192, %s3728_s23  ;;  %s3114_s16 = sshll.u32 %s3728_s23, 6  ;;  %708 = vst [vmem:[#allocation2] sm:$0xff] (!%p3020_p5), %v704_v0  ;;  %709 = vst [vmem:[#allocation2 + $0x8] sm:$0xff] (!%p3020_p5), %v705_v1  ;;  %v707_v3 = vld [vmem:[%s4235_s0 + $0x18] sm:$0xff] (!%p3020_p5) }
  0x19   : > { %s3334_s17 = smul.u32 3, %s3728_s23  ;;  %s3744_s25 = scalar_lea.vmem %s4264_s5, %s3114_s16  ;;  %710 = vst [vmem:[#allocation2 + $0x10] sm:$0xff] (!%p3020_p5), %v706_v2  ;;  %711 = vst [vmem:[#allocation2 + $0x18] sm:$0xff] (!%p3020_p5), %v707_v3 }
  0x1a   : > { %s3749_s15 = scalar_lea.vmem %s4265_s3, %s3333_s30  ;;  %s677_s21 = scalar_lea.vmem %s4242_s7, %s3728_s23 }
  0x1b   : > { %s3758_s29 = scalar_lea.vmem %s4239_s4, %s3334_s17  ;;  %s3115_s19 = sshll.u32 %s3728_s23, 7 }
  0x1c   : > { %s3772_s3 = scalar_lea.vmem %s4244_s9, %s3115_s19  ;;  %s3017_s20 = sshll.u32 %s3728_s23, 1 }
  0x1d   : > { %s3778_s17 = scalar_lea.vmem %s4245_s10, %s3017_s20  ;;  %s3783_s2 = scalar_lea.vmem %s4246_s11, %s3115_s19 }
  0x1e   : > { %s697_s24 = scalar_lea.vmem %s4247_s12, %s3728_s23  ;;  %703 = sbr.rel (%p3020_p5) target bundleno = 37 (0x25), region = 84 }
  0x25 PF: > { %v712_v4 = vld [vmem:[#allocation2] sm:$0xff]  ;;  %v714_v5 = vld [vmem:[#allocation2 + $0x10] sm:$0xff]  ;;  %v713_v6 = vld [vmem:[#allocation2 + $0x8] sm:$0xff]  ;;  %v3616_v43 = vmov 0   ;;  %s4266_s28 = scalar_lea.vmem %s4236_s1, %s3728_s23  ;;  %s4267_s22 = sld [smem:[#allocation10_spill]]  ;;  %vm3618_vm0 = vmmov 0  }
  0x26   : > { %718 = vadd.xlane.f32.xlu0 %v712_v4  ;;  %722 = vadd.xlane.f32.xlu1 %v714_v5  ;;  %v715_v7 = vld [vmem:[#allocation2 + $0x18] sm:$0xff]  ;;  %v3374_v8 = vld [vmem:[%s3749_s15 + $0x4] ss:$12 sps:$4 sm:$0xff]   ;;  %v3376_v9 = vld [vmem:[%s3749_s15] ss:$12 sps:$4 sm:$0xff]   ;;  %vm1070_vm1 = vcmask 261120   ;;  %s4269_s19 = scalar_lea.vmem %s4241_s6, %s3728_s23 }
  0x27   : > { %v3377_v10 = vld [vmem:[%s3749_s15 + $0x1c] ss:$12 sps:$4 sm:$0xff]   ;;  %962 = vmatprep.subr.bf16.mxu0 %v3374_v8  ;;  %v3380_v28 = vld [vmem:[%s3749_s15 + $0x18] ss:$12 sps:$4 sm:$0xff]   ;;  %v3381_v29 = vld [vmem:[%s3749_s15 + $0x34] ss:$12 sps:$4 sm:$0xff]   ;;  %994 = vmatprep.mubr.bf16.mxu0 %v3616_v43 }
  0x28   : > { %v3379_v11 = vld [vmem:[%s3749_s15 + $0x8] ss:$12 sps:$4 sm:$0xff]   ;;  %963 = vmatpush1.bf16.msra.mxu0 %v3376_v9  ;;  %v3383_v30 = vld [vmem:[%s3749_s15 + $0x20] ss:$12 sps:$4 sm:$0xff]   ;;  %v3384_v31 = vld [vmem:[%s3749_s15 + $0x30] ss:$12 sps:$4 sm:$0xff]  }
  0x29   : > { %3197 = vmatprep.subr.bf16.mxu1 %v3379_v11  ;;  %964 = vmatprep.subr.bf16.mxu0 %v3377_v10  ;;  %v3385_v32 = vld [vmem:[%s3749_s15 + $0x4c] ss:$12 sps:$4 sm:$0xff]   ;;  %v3388_v34 = vld [vmem:[%s3749_s15 + $0x48] ss:$12 sps:$4 sm:$0xff]   ;;  %v3389_v35 = vld [vmem:[%s3749_s15 + $0x64] ss:$12 sps:$4 sm:$0xff]  }
  0x2a   : > { %720 = vadd.xlane.f32.xlu0 %v713_v6  ;;  %724 = vadd.xlane.f32.xlu1 %v715_v7  ;;  %v3387_v33 = vld [vmem:[%s3749_s15 + $0x38] ss:$12 sps:$4 sm:$0xff]   ;;  %v3391_v36 = vld [vmem:[%s3749_s15 + $0x50] ss:$12 sps:$4 sm:$0xff]   ;;  %v3392_v37 = vld [vmem:[%s3749_s15 + $0x60] ss:$12 sps:$4 sm:$0xff]  }
  0x2b   : > { %3198 = vmatpush3.bf16.msra.mxu1 %v3379_v11  ;;  %v3393_v38 = vld [vmem:[%s3749_s15 + $0x7c] ss:$12 sps:$4 sm:$0xff]   ;;  %v3396_v40 = vld [vmem:[%s3749_s15 + $0x78] ss:$12 sps:$4 sm:$0xff]   ;;  %v3397_v41 = vld [vmem:[%s3749_s15 + $0x94] ss:$12 sps:$4 sm:$0xff]   ;;  %s4268_s30 = scalar_lea.vmem %s4267_s22, %s3728_s23 }
  0x2c   : > { %965 = vmatpush1.bf16.msra.mxu0 %v3380_v28  ;;  %3199 = vmatprep.subr.bf16.mxu1 %v3383_v30  ;;  %v3395_v39 = vld [vmem:[%s3749_s15 + $0x68] ss:$12 sps:$4 sm:$0xff]   ;;  %v3399_v42 = vld [vmem:[%s3749_s15 + $0x80] ss:$12 sps:$4 sm:$0xff]   ;;  %v3400_v44 = vld [vmem:[%s3749_s15 + $0x90] ss:$12 sps:$4 sm:$0xff]  }
  0x2d   : > { %966 = vmatprep.subr.bf16.mxu0 %v3381_v29  ;;  %v3401_v45 = vld [vmem:[%s3749_s15 + $0xac] ss:$12 sps:$4 sm:$0xff]   ;;  %v3404_v47 = vld [vmem:[%s3749_s15 + $0xa8] ss:$12 sps:$4 sm:$0xff]   ;;  %v3405_v48 = vld [vmem:[%s3749_s15 + $0xb0] ss:$12 sps:$4 sm:$0xff]  }
  0x2e   : > { %v3403_v46 = vld [vmem:[%s3749_s15 + $0x98] ss:$12 sps:$4 sm:$0xff]   ;;  %v3021_v63 = vld [vmem:[%s4266_s28] ss:$0 sm:$0xff]  ;;  %vm1169_vm2 = vcmask 130048   ;;  %s3620_s14 = smov 64   ;;  %s4270_s28 = scalar_lea.vmem %s4243_s8, %s3728_s23 }
  0x2f   : > { %3200 = vmatpush3.bf16.msra.mxu1 %v3383_v30  ;;  %s3621_s20 = smov 32   ;;  %vm1576_vm3 = vcmask 523520   ;;  %vm1843_vm4 = vcmask 785920   ;;  %vm2110_vm5 = vcmask 1048320   ;;  %p3107_p6 = scmp.ne.s32.totalorder %s3606_s18, 1 }
  0x30   : > { %967 = vmatpush1.bf16.msra.mxu0 %v3384_v31  ;;  %3201 = vmatprep.subr.bf16.mxu1 %v3387_v33  ;;  %s4272_s16 = sld [smem:[#allocation14_spill]] (!%p3107_p6) }
  0x31   : > { %968 = vmatprep.subr.bf16.mxu0 %v3385_v32 }
  0x33   : > { %3202 = vmatpush3.bf16.msra.mxu1 %v3387_v33 }
  0x34   : > { %969 = vmatpush1.bf16.msra.mxu0 %v3388_v34  ;;  %3203 = vmatprep.subr.bf16.mxu1 %v3391_v36 }
  0x35   : > { %970 = vmatprep.subr.bf16.mxu0 %v3389_v35 }
  0x37   : > { %3204 = vmatpush3.bf16.msra.mxu1 %v3391_v36 }
  0x38   : > { %971 = vmatpush1.bf16.msra.mxu0 %v3392_v37  ;;  %3205 = vmatprep.subr.bf16.mxu1 %v3395_v39 }
  0x39   : > { %972 = vmatprep.subr.bf16.mxu0 %v3393_v38 }
  0x3b   : > { %3206 = vmatpush3.bf16.msra.mxu1 %v3395_v39 }
  0x3c   : > { %973 = vmatpush1.bf16.msra.mxu0 %v3396_v40  ;;  %3207 = vmatprep.subr.bf16.mxu1 %v3399_v42 }
  0x3d   : > { %974 = vmatprep.subr.bf16.mxu0 %v3397_v41 }
  0x3f   : > { %3208 = vmatpush3.bf16.msra.mxu1 %v3399_v42 }
  0x40   : > { %975 = vmatpush1.bf16.msra.mxu0 %v3400_v44  ;;  %3209 = vmatprep.subr.bf16.mxu1 %v3403_v46 }
  0x41   : > { %976 = vmatprep.subr.bf16.mxu0 %v3401_v45 }
  0x43   : > { %3210 = vmatpush3.bf16.msra.mxu1 %v3403_v46 }
  0x44   : > { %977 = vmatpush1.bf16.msra.mxu0 %v3404_v47  ;;  %3211 = vmatprep.subr.bf16.mxu1 %v3405_v48 }
  0x47   : > { %3212 = vmatpush3.bf16.msra.mxu1 %v3405_v48 }
  0xb3   : > { %v719_v12 = vpop.xlane.xlu0 %718  ;;  %v723_v13 = vpop.xlane.xlu1 %722 }
  0xb4   : > { %v727_v14 = vmul.f32 0.0078125, %v719_v12  ;;  %v729_v15 = vmul.f32 0.0078125, %v723_v13 }
  0xb6   : > { %v3806_v16 = vsub.f32 %v712_v4, %v727_v14  ;;  %v3808_v17 = vsub.f32 %v714_v5, %v729_v15  ;;  %v3022_v4 = vld [vmem:[%s4268_s30] ss:$0 sm:$0xff] }
  0xb7   : > { %v721_v18 = vpop.xlane.xlu0 %720  ;;  %v725_v19 = vpop.xlane.xlu1 %724 }
  0xb8   : > { %v728_v20 = vmul.f32 0.0078125, %v721_v18  ;;  %v735_v21 = vmul.f32 %v3806_v16, %v3806_v16  ;;  %v730_v22 = vmul.f32 0.0078125, %v725_v19  ;;  %v737_v25 = vmul.f32 %v3808_v17, %v3808_v17 }
  0xb9   : > { %v819_v18 = vlaneseq }
  0xba   : > { %v3812_v23 = vsub.f32 %v713_v6, %v728_v20  ;;  %739 = vadd.xlane.f32.xlu0 %v735_v21  ;;  %v3814_v24 = vsub.f32 %v715_v7, %v730_v22  ;;  %v817_v21 = vld [vmem:[%s3758_s29] sm:$0x7]  ;;  %s3619_s29 = smov 96  }
  0xbb   : > { %v3864_v19 = vshrl.u32 %v819_v18, 7 }
  0xbc   : > { %v736_v26 = vmul.f32 %v3812_v23, %v3812_v23  ;;  %v738_v27 = vmul.f32 %v3814_v24, %v3814_v24 }
  0xbd   : > { %v821_v20 = vsub.s32 0, %v3864_v19  ;;  %v825_v22 = vsub.s32 1, %v3864_v19 }
  0xbe   : > { %743 = vadd.xlane.f32.xlu0 %v737_v25  ;;  %741 = vadd.xlane.f32.xlu1 %v736_v26 }
  0xbf   : > { %v826_v26 = vrot.slane %v817_v21, %v825_v22 }
  0xc2   : > { %745 = vadd.xlane.f32.xlu1 %v738_v27 }
 0x147   : > { %v740_v49 = vpop.xlane.xlu0 %739 }
 0x148   : > { %v747_v50 = vmul.f32 0.0078125, %v740_v49 }
 0x14a   : > { %v751_v51 = vadd.f32 2e-06, %v747_v50 }
 0x14b   : > { %v742_v52 = vpop.xlane.xlu1 %741  ;;  %v744_v53 = vpop.xlane.xlu0 %743 }
 0x14c   : > { %3454 = vrsqrt.f32 %v751_v51  ;;  %v748_v54 = vmul.f32 0.0078125, %v742_v52  ;;  %v749_v55 = vmul.f32 0.0078125, %v744_v53 }
 0x14e   : > { %v752_v56 = vadd.f32 2e-06, %v748_v54  ;;  %v753_v57 = vadd.f32 2e-06, %v749_v55 }
 0x14f   : > { %v746_v58 = vpop.xlane.xlu1 %745 }
 0x150   : > { %3456 = vrsqrt.f32 %v752_v56  ;;  %v750_v59 = vmul.f32 0.0078125, %v746_v58 }
 0x151   : > { %3458 = vrsqrt.f32 %v753_v57 }
 0x152   : > { %v754_v60 = vadd.f32 2e-06, %v750_v59 }
 0x154   : > { %3460 = vrsqrt.f32 %v754_v60 }
 0x156   : > { %v3455_v61 = vpop.eup %3454 }
 0x157   : > { %v759_v62 = vmul.f32 %v3455_v61, %v3806_v16 }
 0x159   : > { %v769_v3 = vmul.f32 %v3021_v63, %v759_v62 }
 0x15a   : > { %v3457_v0 = vpop.eup %3456 }
 0x15b   : > { %v3459_v1 = vpop.eup %3458  ;;  %v760_v2 = vmul.f32 %v3457_v0, %v3812_v23  ;;  %v779_v8 = vadd.f32 %v3022_v4, %v769_v3  ;;  %v822_v23 = vrot.slane %v817_v21, %v821_v20 }
 0x15c   : > { %v761_v5 = vmul.f32 %v3459_v1, %v3808_v17  ;;  %v3617_v17 = vmov 0.0  }
 0x15d   : > { %v770_v6 = vmul.f32 %v3021_v63, %v760_v2  ;;  %3217 = vmatprep.subr.bf16.mxu0 %v3617_v17  ;;  %3229 = vmatprep.subr.bf16.mxu1 %v3617_v17 }
 0x15e   : > { %v3461_v7 = vpop.eup %3460  ;;  %v771_v11 = vmul.f32 %v3021_v63, %v761_v5 }
 0x15f   : > { %v780_v9 = vadd.f32 %v3022_v4, %v770_v6  ;;  %v762_v10 = vmul.f32 %v3461_v7, %v3814_v24  ;;  %v829_v24 = vsub.s32 2, %v3864_v19 }
 0x160   : > { %v781_v14 = vadd.f32 %v3022_v4, %v771_v11 }
 0x161   : > { %v783_v12 = vpack.c.bf16 %v780_v9, %v779_v8  ;;  %v772_v13 = vmul.f32 %v3021_v63, %v762_v10  ;;  %v830_v32 = vrot.slane %v817_v21, %v829_v24 }
 0x163   : > { %995 = vmatmul.mubr.bf16.vlgmr.msra.gmra.mrb[0].mxu0 %v783_v12  ;;  %3213 = vmatprep.mubr.bf16.mxu1 %v783_v12  ;;  %v782_v15 = vadd.f32 %v3022_v4, %v772_v13 }
 0x164   : > { %1004 = vmatprep.mubr.bf16.mxu0 %v3616_v43 }
 0x165   : > { %v784_v16 = vpack.c.bf16 %v782_v15, %v781_v14 }
 0x167   : > { %3214 = vmatmul.mubr.bf16.vlgmr.msra.gmra.mrb[0].mxu1 %v784_v16 }
 0x168   : > { %3231 = vmatprep.mubr.msk.bf16.mxu1 %vm3618_vm0, %v3617_v17 }
 0x16b   : > { %1005 = vmatmul.mubr.bf16.gmra.mrb[4].mxu0 %v784_v16 }
 0x16c   : > { %3219 = vmatprep.mubr.msk.bf16.mxu0 %vm3618_vm0, %v3617_v17 }
 0x236   : > { %v996_v25 = vpop.f32.mrb[0].mxu0 }
 0x237   : > { %v998_v27 = vpop.f32.mrb[1].mxu0  ;;  %v997_v29 = vadd.f32 %v996_v25, %v822_v23 }
 0x238   : > { %v1000_v28 = vpop.f32.mrb[2].mxu0  ;;  %v999_v33 = vadd.f32 %v998_v27, %v826_v26 }
 0x239   : > { %v1001_v30 = vadd.f32 %v1000_v28, %v822_v23  ;;  %v1002_v31 = vpop.f32.mrb[3].mxu0 }
 0x23a   : > { %v1003_v34 = vadd.f32 %v1002_v31, %v826_v26  ;;  %v3215_v35 = vpop.f32.mrb[0].mxu1 }
 0x23b   : > { %v3874_v36 = vpack.c.bf16 %v1001_v30, %v997_v29  ;;  %v1049_v37 = vpop.f32.mrb[1].mxu1  ;;  %v1058_v40 = vadd.f32 %v3215_v35, %v830_v32 }
 0x23c   : > { %v3876_v38 = vpack.c.bf16 %v1003_v34, %v999_v33  ;;  %v3216_v39 = vpop.f32.mrb[2].mxu1  ;;  %v1050_v44 = vadd.f32 %v1049_v37, %v830_v32 }
 0x23d   : > { %v1061_v41 = vadd.f32 %v3216_v39, %v830_v32  ;;  %v1052_v42 = vpop.f32.mrb[3].mxu1 }
 0x23e   : > { %v1053_v45 = vadd.f32 %v1052_v42, %v830_v32  ;;  %v1006_v46 = vpop.f32.mrb[4].mxu0  ;;  %v1075_v47 = vsel %vm1070_vm1, %v3876_v38, 0 }
 0x23f   : > { %v3880_v48 = vpack.c.bf16 %v1061_v41, %v1058_v40  ;;  %v1008_v49 = vpop.f32.mrb[5].mxu0  ;;  %3218 = vmatpush3.bf16.xpose.msra.mxu0 %v1075_v47  ;;  %v1007_v52 = vadd.f32 %v1006_v46, %v822_v23 }
 0x240   : > { %v3882_v50 = vpack.c.bf16 %v1053_v45, %v1050_v44  ;;  %v1010_v51 = vpop.f32.mrb[6].mxu0  ;;  %3223 = vmatprep.subr.bf16.mxu0 %v3617_v17  ;;  %v1009_v55 = vadd.f32 %v1008_v49, %v826_v26 }
 0x241   : > { %v1011_v53 = vadd.f32 %v1010_v51, %v822_v23  ;;  %v1012_v54 = vpop.f32.mrb[7].mxu0 }
 0x242   : > { %v1013_v56 = vadd.f32 %v1012_v54, %v826_v26  ;;  %3230 = vmatpush3.bf16.msra.mxu1 %v3882_v50 }
 0x243   : > { %v3886_v57 = vpack.c.bf16 %v1011_v53, %v1007_v52  ;;  %3241 = vmatprep.subr.bf16.mxu1 %v3617_v17 }
 0x244   : > { %v3889_v58 = vpack.c.bf16 %v1013_v56, %v1009_v55 }
 0x246   : > { %3220 = vmatmul.mubr.msk.bf16.vlgmr.msra.gmra.mrb[8].mxu0 %vm1070_vm1, %v3874_v36  ;;  %v1122_v59 = vsel %vm1070_vm1, %v3889_v58, 0 }
 0x247   : > { %3224 = vmatpush3.bf16.xpose.msra.mxu0 %v1122_v59  ;;  %3225 = vmatprep.mubr.msk.bf16.mxu0 %vm3618_vm0, %v3617_v17 }
 0x248   : > { %3235 = vmatprep.subr.bf16.mxu0 %v3617_v17 }
 0x24e   : > { %3226 = vmatmul.mubr.msk.bf16.vlgmr.msra.gmra.mrb[12].mxu0 %vm1070_vm1, %v3886_v57 }
 0x24f   : > { %3236 = vmatpush3.bf16.msra.mxu0 %v3880_v48  ;;  %3237 = vmatprep.mubr.msk.bf16.mxu0 %vm3618_vm0, %v3617_v17 }
 0x250   : > { %3247 = vmatprep.subr.bf16.mxu0 %v3617_v17 }
 0x319   : > { %v1111_v60 = vpop.f32.mrb[8].mxu0 }
 0x31a   : > { %v1165_v61 = vmul.f32 0.17677669, %v1111_v60  ;;  %v3221_v62 = vpop.f32.mrb[9].mxu0 }
 0x31b   : > { %v1114_v63 = vpop.f32.mrb[10].mxu0 }
 0x31c   : > { %v1166_v0 = vmul.f32 0.17677669, %v1114_v63  ;;  %v3222_v1 = vpop.f32.mrb[11].mxu0  ;;  %v1170_v2 = vsel %vm1169_vm2, %v1165_v61, -inf }
 0x31d   : > { %1171 = vmax.xlane.f32.xlu0 %v1170_v2 }
 0x31e   : > { %v1173_v3 = vsel %vm1169_vm2, %v1166_v0, -inf }
 0x31f   : > { %1174 = vmax.xlane.f32.xlu1 %v1173_v3 }
 0x321   : > { %v1158_v4 = vpop.f32.mrb[12].mxu0 }
 0x322   : > { %v1167_v5 = vmul.f32 0.17677669, %v1158_v4  ;;  %v3227_v6 = vpop.f32.mrb[13].mxu0 }
 0x323   : > { %v1161_v7 = vpop.f32.mrb[14].mxu0 }
 0x324   : > { %v1168_v8 = vmul.f32 0.17677669, %v1161_v7  ;;  %v3228_v9 = vpop.f32.mrb[15].mxu0  ;;  %v1176_v10 = vsel %vm1169_vm2, %v1167_v5, -inf }
 0x325   : > { %1177 = vmax.xlane.f32.xlu0 %v1176_v10 }
 0x326   : > { %v1179_v11 = vsel %vm1169_vm2, %v1168_v8, -inf }
 0x327   : > { %1180 = vmax.xlane.f32.xlu1 %v1179_v11 }
 0x3aa   : > { %v1172_v12 = vpop.xlane.xlu0 %1171 }
 0x3ab   : > { %v1182_v13 = vsub.f32 %v1165_v61, %v1172_v12 }
 0x3ac   : > { %v1175_v14 = vpop.xlane.xlu1 %1174 }
 0x3ad   : > { %v1186_v15 = vmul.f32 1.442695, %v1182_v13  ;;  %v1183_v16 = vsub.f32 %v1166_v0, %v1175_v14 }
 0x3af   : > { %3462 = vpow2.f32 %v1186_v15  ;;  %v1188_v18 = vmul.f32 1.442695, %v1183_v16 }
 0x3b1   : > { %3464 = vpow2.f32 %v1188_v18 }
 0x3b2   : > { %v1178_v21 = vpop.xlane.xlu0 %1177 }
 0x3b3   : > { %v1184_v23 = vsub.f32 %v1167_v5, %v1178_v21 }
 0x3b4   : > { %v1181_v31 = vpop.xlane.xlu1 %1180 }
 0x3b5   : > { %v1190_v24 = vmul.f32 1.442695, %v1184_v23  ;;  %v1185_v32 = vsub.f32 %v1168_v8, %v1181_v31 }
 0x3b7   : > { %3466 = vpow2.f32 %v1190_v24  ;;  %v1192_v33 = vmul.f32 1.442695, %v1185_v32 }
 0x3b9   : > { %v3463_v25 = vpop.eup %3462  ;;  %3468 = vpow2.f32 %v1192_v33 }
 0x3ba   : > { %v1194_v26 = vsel %vm1169_vm2, %v3463_v25, 0.0 }
 0x3bb   : > { %v3465_v27 = vpop.eup %3464  ;;  %1195 = vadd.xlane.f32.xlu0 %v1194_v26 }
 0x3bc   : > { %v1197_v28 = vsel %vm1169_vm2, %v3465_v27, 0.0 }
 0x3bd   : > { %1198 = vadd.xlane.f32.xlu1 %v1197_v28 }
 0x3c1   : > { %v3467_v29 = vpop.eup %3466 }
 0x3c2   : > { %v1200_v30 = vsel %vm1169_vm2, %v3467_v29, 0.0 }
 0x3c3   : > { %1201 = vadd.xlane.f32.xlu0 %v1200_v30  ;;  %v3469_v34 = vpop.eup %3468 }
 0x3c4   : > { %v1203_v35 = vsel %vm1169_vm2, %v3469_v34, 0.0 }
 0x3ce   : > { %1365 = vrot.lane.b32.xlu1 %v3889_v58, %s3619_s29 }
 0x3d9   : > { %1312 = vrot.lane.b32.xlu0 %v3876_v38, %s3619_s29 }
 0x3f2   : > { %1204 = vadd.xlane.f32.xlu1 %v1203_v35 }
 0x403   : > { %1309 = vrot.lane.b32.xlu1 %v3874_v36, %s3619_s29 }
 0x407   : > { %1362 = vrot.lane.b32.xlu1 %v3886_v57, %s3619_s29 }
 0x448   : > { %v1196_v37 = vpop.xlane.xlu0 %1195 }
 0x449   : > { %3470 = vrcp.f32 %v1196_v37 }
 0x44a   : > { %v1199_v39 = vpop.xlane.xlu1 %1198 }
 0x44b   : > { %3472 = vrcp.f32 %v1199_v39 }
 0x44e   : > { %v1366_v51 = vpop.permute.xlu1 %1365 }
 0x44f   : > { %v1371_v61 = vsel %vm1070_vm1, %v1366_v51, 0 }
 0x450   : > { %v1202_v40 = vpop.xlane.xlu0 %1201 }
 0x451   : > { %3474 = vrcp.f32 %v1202_v40 }
 0x453   : > { %v3471_v41 = vpop.eup %3470 }
 0x454   : > { %v1210_v44 = vmul.f32 %v3471_v41, %v3463_v25  ;;  %v1313_v46 = vpop.permute.xlu0 %1312 }
 0x455   : > { %v3473_v42 = vpop.eup %3472  ;;  %v1318_v49 = vsel %vm1070_vm1, %v1313_v46, 0 }
 0x456   : > { %v1211_v45 = vmul.f32 %v3473_v42, %v3465_v27 }
 0x458   : > { %v1214_v47 = vpack.c.bf16 %v1211_v45, %v1210_v44 }
 0x45a   : > { %3232 = vmatmul.mubr.msk.bf16.vlgmr.msra.gmra.mrb[4].mxu1 %vm1169_vm2, %v1214_v47 }
 0x45b   : > { %3242 = vmatpush3.bf16.xpose.msra.mxu1 %v1318_v49  ;;  %3243 = vmatprep.mubr.msk.bf16.mxu1 %vm3618_vm0, %v3617_v17  ;;  %v3475_v54 = vpop.eup %3474 }
 0x45c   : > { %3253 = vmatprep.subr.bf16.mxu1 %v3617_v17  ;;  %v1212_v56 = vmul.f32 %v3475_v54, %v3467_v29 }
 0x47f   : > { %v1205_v52 = vpop.xlane.xlu1 %1204 }
 0x480   : > { %3476 = vrcp.f32 %v1205_v52 }
 0x483   : > { %v1310_v53 = vpop.permute.xlu1 %1309 }
 0x484   : > { %3244 = vmatmul.mubr.msk.bf16.vlgmr.msra.gmra.mrb[8].mxu1 %vm1070_vm1, %v1310_v53 }
 0x485   : > { %3255 = vmatprep.mubr.msk.bf16.mxu1 %vm3618_vm0, %v3617_v17 }
 0x487   : > { %v1363_v62 = vpop.permute.xlu1 %1362 }
 0x48a   : > { %v3477_v55 = vpop.eup %3476 }
 0x48b   : > { %v1213_v59 = vmul.f32 %v3477_v55, %v3469_v34 }
 0x48d   : > { %v1215_v60 = vpack.c.bf16 %v1213_v59, %v1212_v56 }
 0x48f   : > { %3238 = vmatmul.mubr.msk.bf16.vlgmr.msra.gmra.mrb[16].mxu0 %vm1169_vm2, %v1215_v60 }
 0x490   : > { %3248 = vmatpush3.bf16.xpose.msra.mxu0 %v1371_v61  ;;  %3249 = vmatprep.mubr.msk.bf16.mxu0 %vm3618_vm0, %v3617_v17 }
 0x491   : > { %3259 = vmatprep.subr.bf16.mxu0 %v3617_v17 }
 0x497   : > { %3250 = vmatmul.mubr.msk.bf16.vlgmr.msra.gmra.mrb[20].mxu0 %vm1070_vm1, %v1363_v62 }
 0x498   : > { %3261 = vmatprep.mubr.msk.bf16.mxu0 %vm3618_vm0, %v3617_v17 }
 0x52d   : > { %v1253_v63 = vpop.f32.mrb[4].mxu1 }
 0x52e   : > { %1304 = vst.msk [vmem:[#allocation3] sm:$0xff] %vm1070_vm1, %v1253_v63  ;;  %v3233_v0 = vpop.f32.mrb[5].mxu1 }
 0x52f   : > { %v1256_v1 = vpop.f32.mrb[6].mxu1 }
 0x530   : > { %1305 = vst.msk [vmem:[#allocation3 + $0x8] sm:$0xff] %vm1070_vm1, %v1256_v1  ;;  %v3234_v2 = vpop.f32.mrb[7].mxu1 }
 0x557   : > { %v1354_v3 = vpop.f32.mrb[8].mxu1 }
 0x558   : > { %v1414_v4 = vmul.f32 0.17677669, %v1354_v3  ;;  %v3245_v5 = vpop.f32.mrb[9].mxu1 }
 0x559   : > { %v1357_v6 = vpop.f32.mrb[10].mxu1 }
 0x55a   : > { %v1415_v7 = vmul.f32 0.17677669, %v1357_v6  ;;  %v3246_v8 = vpop.f32.mrb[11].mxu1  ;;  %v1418_v9 = vsel %vm1169_vm2, %v1414_v4, -inf }
 0x55b   : > { %1419 = vmax.xlane.f32.xlu0 %v1418_v9 }
 0x55c   : > { %v1421_v10 = vsel %vm1169_vm2, %v1415_v7, -inf }
 0x55d   : > { %1422 = vmax.xlane.f32.xlu1 %v1421_v10 }
 0x562   : > { %v1297_v11 = vpop.f32.mrb[16].mxu0 }
 0x563   : > { %1306 = vst.msk [vmem:[#allocation3 + $0x10] sm:$0xff] %vm1070_vm1, %v1297_v11  ;;  %v3239_v12 = vpop.f32.mrb[17].mxu0 }
 0x564   : > { %v1300_v13 = vpop.f32.mrb[18].mxu0 }
 0x565   : > { %1307 = vst.msk [vmem:[#allocation3 + $0x18] sm:$0xff] %vm1070_vm1, %v1300_v13  ;;  %v3240_v14 = vpop.f32.mrb[19].mxu0 }
 0x56a   : > { %v1407_v15 = vpop.f32.mrb[20].mxu0 }
 0x56b   : > { %v1416_v16 = vmul.f32 0.17677669, %v1407_v15  ;;  %v3251_v18 = vpop.f32.mrb[21].mxu0 }
 0x56c   : > { %v1410_v21 = vpop.f32.mrb[22].mxu0 }
 0x56d   : > { %v1417_v23 = vmul.f32 0.17677669, %v1410_v21  ;;  %v3252_v24 = vpop.f32.mrb[23].mxu0  ;;  %v1424_v25 = vsel %vm1169_vm2, %v1416_v16, -inf }
 0x56e   : > { %1425 = vmax.xlane.f32.xlu0 %v1424_v25 }
 0x56f   : > { %v1427_v26 = vsel %vm1169_vm2, %v1417_v23, -inf }
 0x572   : > { %1428 = vmax.xlane.f32.xlu0 %v1427_v26 }
 0x5e8   : > { %v1420_v27 = vpop.xlane.xlu0 %1419 }
 0x5e9   : > { %v1430_v28 = vsub.f32 %v1414_v4, %v1420_v27 }
 0x5ea   : > { %v1423_v29 = vpop.xlane.xlu1 %1422 }
 0x5eb   : > { %v1434_v30 = vmul.f32 1.442695, %v1430_v28  ;;  %v1431_v31 = vsub.f32 %v1415_v7, %v1423_v29 }
 0x5ed   : > { %3478 = vpow2.f32 %v1434_v30  ;;  %v1436_v32 = vmul.f32 1.442695, %v1431_v31 }
 0x5ef   : > { %3480 = vpow2.f32 %v1436_v32 }
 0x5f7   : > { %v3479_v33 = vpop.eup %3478 }
 0x5f8   : > { %v1442_v34 = vsel %vm1169_vm2, %v3479_v33, 0.0 }
 0x5f9   : > { %v3481_v35 = vpop.eup %3480  ;;  %1443 = vadd.xlane.f32.xlu0 %v1442_v34 }
 0x5fa   : > { %v1445_v37 = vsel %vm1169_vm2, %v3481_v35, 0.0 }
 0x5fb   : > { %1446 = vadd.xlane.f32.xlu1 %v1445_v37  ;;  %v1426_v39 = vpop.xlane.xlu0 %1425 }
 0x5fc   : > { %v1432_v40 = vsub.f32 %v1416_v16, %v1426_v39 }
 0x5fe   : > { %v1438_v41 = vmul.f32 1.442695, %v1432_v40 }
 0x5ff   : > { %v1429_v45 = vpop.xlane.xlu0 %1428 }
 0x600   : > { %3482 = vpow2.f32 %v1438_v41  ;;  %v1433_v46 = vsub.f32 %v1417_v23, %v1429_v45 }
 0x602   : > { %v1440_v47 = vmul.f32 1.442695, %v1433_v46 }
 0x604   : > { %3484 = vpow2.f32 %v1440_v47 }
 0x60a   : > { %v3483_v42 = vpop.eup %3482 }
 0x60b   : > { %v1448_v44 = vsel %vm1169_vm2, %v3483_v42, 0.0 }
 0x60c   : > { %1513 = vrot.lane.b32.xlu1 %v3880_v48, %s3619_s29  ;;  %1449 = vadd.xlane.f32.xlu0 %v1448_v44 }
 0x60e   : > { %v3485_v49 = vpop.eup %3484 }
 0x60f   : > { %v1451_v51 = vsel %vm1169_vm2, %v3485_v49, 0.0 }
 0x610   : > { %1583 = vrot.lane.b32.xlu1 %v3876_v38, %s3620_s14 }
 0x622   : > { %1465 = vrot.lane.b32.xlu0 %v3882_v50, %s3619_s29 }
 0x626   : > { %1581 = vrot.lane.b32.xlu0 %v3874_v36, %s3620_s14 }
 0x634   : > { %1452 = vadd.xlane.f32.xlu1 %v1451_v51 }
 0x645   : > { %1634 = vrot.lane.b32.xlu1 %v3889_v58, %s3620_s14 }
 0x649   : > { %1632 = vrot.lane.b32.xlu1 %v3886_v57, %s3620_s14 }
 0x686   : > { %v1444_v54 = vpop.xlane.xlu0 %1443 }
 0x688   : > { %v1447_v52 = vpop.xlane.xlu1 %1446 }
 0x689   : > { %3486 = vrcp.f32 %v1447_v52 }
 0x68a   : > { %3488 = vrcp.f32 %v1444_v54 }
 0x68c   : > { %v1514_v53 = vpop.permute.xlu1 %1513 }
 0x68d   : > { %3260 = vmatpush3.bf16.msra.mxu0 %v1514_v53 }
 0x68e   : > { %3271 = vmatprep.subr.bf16.mxu0 %v3617_v17 }
 0x690   : > { %v1584_v0 = vpop.permute.xlu1 %1583 }
 0x691   : > { %v1589_v1 = vsel %vm1070_vm1, %v1584_v0, 0 }
 0x693   : > { %v3487_v55 = vpop.eup %3486 }
 0x694   : > { %v3489_v59 = vpop.eup %3488  ;;  %v1459_v60 = vmul.f32 %v3487_v55, %v3481_v35 }
 0x695   : > { %v1458_v61 = vmul.f32 %v3489_v59, %v3479_v33 }
 0x697   : > { %v1462_v63 = vpack.c.bf16 %v1459_v60, %v1458_v61 }
 0x699   : > { %v1450_v56 = vpop.xlane.xlu0 %1449 }
 0x69a   : > { %3490 = vrcp.f32 %v1450_v56 }
 0x69d   : > { %v1466_v62 = vpop.permute.xlu0 %1465 }
 0x69e   : > { %3254 = vmatpush3.bf16.msra.mxu1 %v1466_v62 }
 0x69f   : > { %3265 = vmatprep.subr.bf16.mxu1 %v3617_v17 }
 0x6a1   : > { %3256 = vmatmul.mubr.msk.bf16.vlgmr.msra.gmra.mrb[12].mxu1 %vm1169_vm2, %v1462_v63  ;;  %v1582_v2 = vpop.permute.xlu0 %1581 }
 0x6a2   : > { %3267 = vmatprep.mubr.msk.bf16.mxu1 %vm3618_vm0, %v3617_v17 }
 0x6a4   : > { %v3491_v4 = vpop.eup %3490 }
 0x6a5   : > { %v1460_v6 = vmul.f32 %v3491_v4, %v3483_v42 }
 0x6a7   : > { %3266 = vmatpush3.bf16.xpose.msra.mxu1 %v1589_v1 }
 0x6a8   : > { %3277 = vmatprep.subr.bf16.mxu1 %v3617_v17 }
 0x6ae   : > { %3268 = vmatmul.mubr.msk.bf16.vlgmr.msra.gmra.mrb[16].mxu1 %vm1070_vm1, %v1582_v2 }
 0x6af   : > { %3279 = vmatprep.mubr.msk.bf16.mxu1 %vm3618_vm0, %v3617_v17 }
 0x6c1   : > { %v1453_v3 = vpop.xlane.xlu1 %1452 }
 0x6c2   : > { %3492 = vrcp.f32 %v1453_v3 }
 0x6c5   : > { %v1635_v8 = vpop.permute.xlu1 %1634 }
 0x6c6   : > { %v1640_v10 = vsel %vm1070_vm1, %v1635_v8, 0 }
 0x6c9   : > { %v1633_v11 = vpop.permute.xlu1 %1632 }
 0x6cc   : > { %v3493_v5 = vpop.eup %3492 }
 0x6cd   : > { %v1461_v7 = vmul.f32 %v3493_v5, %v3485_v49 }
 0x6cf   : > { %v1463_v9 = vpack.c.bf16 %v1461_v7, %v1460_v6 }
 0x6d1   : > { %3262 = vmatmul.mubr.msk.bf16.vlgmr.msra.gmra.mrb[24].mxu0 %vm1169_vm2, %v1463_v9 }
 0x6d2   : > { %3272 = vmatpush3.bf16.xpose.msra.mxu0 %v1640_v10  ;;  %3273 = vmatprep.mubr.msk.bf16.mxu0 %vm3618_vm0, %v3617_v17 }
 0x6d3   : > { %3283 = vmatprep.subr.bf16.mxu0 %v3617_v17 }
 0x6d9   : > { %3274 = vmatmul.mubr.msk.bf16.vlgmr.msra.gmra.mrb[28].mxu0 %vm1070_vm1, %v1633_v11 }
 0x6da   : > { %3285 = vmatprep.mubr.msk.bf16.mxu0 %vm3618_vm0, %v3617_v17 }
 0x774   : > { %v3978_v12 = vpop.f32.mrb[12].mxu1 }
 0x775   : > { %v3257_v13 = vpop.f32.mrb[13].mxu1 }
 0x776   : > { %v3980_v14 = vpop.f32.mrb[14].mxu1 }
 0x777   : > { %v3258_v15 = vpop.f32.mrb[15].mxu1 }
 0x781   : > { %v1625_v16 = vpop.f32.mrb[16].mxu1 }
 0x782   : > { %v1683_v18 = vmul.f32 0.17677669, %v1625_v16  ;;  %v3269_v21 = vpop.f32.mrb[17].mxu1 }
 0x783   : > { %v1628_v23 = vpop.f32.mrb[18].mxu1 }
 0x784   : > { %v1684_v24 = vmul.f32 0.17677669, %v1628_v23  ;;  %v3270_v25 = vpop.f32.mrb[19].mxu1  ;;  %v1687_v26 = vsel %vm1169_vm2, %v1683_v18, -inf }
 0x785   : > { %1688 = vmax.xlane.f32.xlu0 %v1687_v26 }
 0x786   : > { %v1690_v27 = vsel %vm1169_vm2, %v1684_v24, -inf }
 0x787   : > { %1691 = vmax.xlane.f32.xlu1 %v1690_v27 }
 0x7a4   : > { %v3984_v28 = vpop.f32.mrb[24].mxu0 }
 0x7a5   : > { %v3263_v29 = vpop.f32.mrb[25].mxu0 }
 0x7a6   : > { %v3986_v30 = vpop.f32.mrb[26].mxu0 }
 0x7a7   : > { %v3264_v31 = vpop.f32.mrb[27].mxu0 }
 0x7ac   : > { %v1676_v32 = vpop.f32.mrb[28].mxu0 }
 0x7ad   : > { %v1685_v33 = vmul.f32 0.17677669, %v1676_v32  ;;  %v3275_v34 = vpop.f32.mrb[29].mxu0 }
 0x7ae   : > { %v1679_v35 = vpop.f32.mrb[30].mxu0 }
 0x7af   : > { %v1686_v37 = vmul.f32 0.17677669, %v1679_v35  ;;  %v3276_v39 = vpop.f32.mrb[31].mxu0  ;;  %v1693_v40 = vsel %vm1169_vm2, %v1685_v33, -inf }
 0x7b0   : > { %1694 = vmax.xlane.f32.xlu0 %v1693_v40 }
 0x7b1   : > { %v1696_v41 = vsel %vm1169_vm2, %v1686_v37, -inf }
 0x7b4   : > { %1697 = vmax.xlane.f32.xlu0 %v1696_v41 }
 0x812   : > { %v1689_v42 = vpop.xlane.xlu0 %1688 }
 0x813   : > { %v1699_v44 = vsub.f32 %v1683_v18, %v1689_v42 }
 0x814   : > { %v1692_v45 = vpop.xlane.xlu1 %1691 }
 0x815   : > { %v1703_v46 = vmul.f32 1.442695, %v1699_v44  ;;  %v1700_v47 = vsub.f32 %v1684_v24, %v1692_v45 }
 0x817   : > { %3494 = vpow2.f32 %v1703_v46  ;;  %v1705_v49 = vmul.f32 1.442695, %v1700_v47 }
 0x819   : > { %3496 = vpow2.f32 %v1705_v49 }
 0x821   : > { %v3495_v51 = vpop.eup %3494 }
 0x822   : > { %v1711_v52 = vsel %vm1169_vm2, %v3495_v51, 0.0 }
 0x823   : > { %v3497_v53 = vpop.eup %3496  ;;  %1712 = vadd.xlane.f32.xlu0 %v1711_v52 }
 0x824   : > { %v1714_v54 = vsel %vm1169_vm2, %v3497_v53, 0.0 }
 0x825   : > { %1715 = vadd.xlane.f32.xlu1 %v1714_v54 }
 0x836   : > { %1780 = vrot.lane.b32.xlu1 %v3880_v48, %s3620_s14 }
 0x83a   : > { %1850 = vrot.lane.b32.xlu1 %v3876_v38, %s3621_s20 }
 0x83d   : > { %v1695_v55 = vpop.xlane.xlu0 %1694 }
 0x83e   : > { %v1701_v56 = vsub.f32 %v1685_v33, %v1695_v55 }
 0x840   : > { %v1707_v59 = vmul.f32 1.442695, %v1701_v56 }
 0x841   : > { %v1698_v60 = vpop.xlane.xlu0 %1697 }
 0x842   : > { %3498 = vpow2.f32 %v1707_v59  ;;  %v1702_v61 = vsub.f32 %v1686_v37, %v1698_v60 }
 0x844   : > { %v1709_v63 = vmul.f32 1.442695, %v1702_v61 }
 0x846   : > { %3500 = vpow2.f32 %v1709_v63 }
 0x84c   : > { %v3499_v62 = vpop.eup %3498 }
 0x84d   : > { %v1717_v0 = vsel %vm1169_vm2, %v3499_v62, 0.0 }
 0x84e   : > { %1718 = vadd.xlane.f32.xlu0 %v1717_v0 }
 0x850   : > { %v3501_v1 = vpop.eup %3500 }
 0x851   : > { %v1720_v2 = vsel %vm1169_vm2, %v3501_v1, 0.0 }
 0x85e   : > { %1721 = vadd.xlane.f32.xlu1 %v1720_v2 }
 0x864   : > { %1733 = vrot.lane.b32.xlu0 %v3882_v50, %s3620_s14 }
 0x868   : > { %1848 = vrot.lane.b32.xlu0 %v3874_v36, %s3621_s20 }
 0x86f   : > { %1901 = vrot.lane.b32.xlu1 %v3889_v58, %s3621_s20 }
 0x873   : > { %1899 = vrot.lane.b32.xlu1 %v3886_v57, %s3621_s20 }
 0x8b0   : > { %v1713_v4 = vpop.xlane.xlu0 %1712 }
 0x8b2   : > { %v1716_v38 = vpop.xlane.xlu1 %1715 }
 0x8b3   : > { %3502 = vrcp.f32 %v1716_v38 }
 0x8b4   : > { %3504 = vrcp.f32 %v1713_v4 }
 0x8b6   : > { %v1781_v3 = vpop.permute.xlu1 %1780 }
 0x8b7   : > { %3284 = vmatpush3.bf16.msra.mxu0 %v1781_v3 }
 0x8b8   : > { %3295 = vmatprep.subr.bf16.mxu0 %v3617_v17 }
 0x8ba   : > { %v1851_v57 = vpop.permute.xlu1 %1850 }
 0x8bb   : > { %v1856_v58 = vsel %vm1070_vm1, %v1851_v57, 0 }
 0x8bd   : > { %v3503_v5 = vpop.eup %3502 }
 0x8be   : > { %v3505_v7 = vpop.eup %3504  ;;  %v1728_v8 = vmul.f32 %v3503_v5, %v3497_v53 }
 0x8bf   : > { %v1727_v9 = vmul.f32 %v3505_v7, %v3495_v51 }
 0x8c1   : > { %v1731_v10 = vpack.c.bf16 %v1728_v8, %v1727_v9 }
 0x8db   : > { %v1719_v6 = vpop.xlane.xlu0 %1718 }
 0x8dc   : > { %3506 = vrcp.f32 %v1719_v6 }
 0x8df   : > { %v1734_v36 = vpop.permute.xlu0 %1733 }
 0x8e0   : > { %3278 = vmatpush3.bf16.msra.mxu1 %v1734_v36 }
 0x8e1   : > { %3289 = vmatprep.subr.bf16.mxu1 %v3617_v17 }
 0x8e3   : > { %3280 = vmatmul.mubr.msk.bf16.vlgmr.msra.gmra.mrb[20].mxu1 %vm1169_vm2, %v1731_v10  ;;  %v1849_v13 = vpop.permute.xlu0 %1848 }
 0x8e4   : > { %3291 = vmatprep.mubr.msk.bf16.mxu1 %vm3618_vm0, %v3617_v17 }
 0x8e6   : > { %v3507_v15 = vpop.eup %3506 }
 0x8e7   : > { %v1729_v18 = vmul.f32 %v3507_v15, %v3499_v62 }
 0x8e9   : > { %3290 = vmatpush3.bf16.xpose.msra.mxu1 %v1856_v58 }
 0x8ea   : > { %3301 = vmatprep.subr.bf16.mxu1 %v3617_v17 }
 0x8eb   : > { %v1722_v11 = vpop.xlane.xlu1 %1721 }
 0x8ec   : > { %3508 = vrcp.f32 %v1722_v11 }
 0x8ef   : > { %v1902_v23 = vpop.permute.xlu1 %1901 }
 0x8f0   : > { %3292 = vmatmul.mubr.msk.bf16.vlgmr.msra.gmra.mrb[24].mxu1 %vm1070_vm1, %v1849_v13  ;;  %v1907_v25 = vsel %vm1070_vm1, %v1902_v23, 0 }
 0x8f1   : > { %3303 = vmatprep.mubr.msk.bf16.mxu1 %vm3618_vm0, %v3617_v17 }
 0x8f3   : > { %v1900_v26 = vpop.permute.xlu1 %1899 }
 0x8f6   : > { %v3509_v16 = vpop.eup %3508 }
 0x8f7   : > { %v1730_v21 = vmul.f32 %v3509_v16, %v3501_v1 }
 0x8f9   : > { %v1732_v24 = vpack.c.bf16 %v1730_v21, %v1729_v18 }
 0x8fb   : > { %3286 = vmatmul.mubr.msk.bf16.vlgmr.msra.gmra.mrb[32].mxu0 %vm1169_vm2, %v1732_v24 }
 0x8fc   : > { %3296 = vmatpush3.bf16.xpose.msra.mxu0 %v1907_v25  ;;  %3297 = vmatprep.mubr.msk.bf16.mxu0 %vm3618_vm0, %v3617_v17 }
 0x8fd   : > { %3307 = vmatprep.subr.bf16.mxu0 %v3617_v17 }
 0x903   : > { %3298 = vmatmul.mubr.msk.bf16.vlgmr.msra.gmra.mrb[36].mxu0 %vm1070_vm1, %v1900_v26 }
 0x904   : > { %3309 = vmatprep.mubr.msk.bf16.mxu0 %vm3618_vm0, %v3617_v17 }
 0x9b6   : > { %v1773_v27 = vpop.f32.mrb[20].mxu1 }
 0x9b7   : > { %v3281_v29 = vpop.f32.mrb[21].mxu1 }
 0x9b8   : > { %v1776_v31 = vpop.f32.mrb[22].mxu1 }
 0x9b9   : > { %v3282_v32 = vpop.f32.mrb[23].mxu1 }
 0x9c3   : > { %v1892_v33 = vpop.f32.mrb[24].mxu1 }
 0x9c4   : > { %v1950_v34 = vmul.f32 0.17677669, %v1892_v33  ;;  %v3293_v35 = vpop.f32.mrb[25].mxu1 }
 0x9c5   : > { %v1895_v37 = vpop.f32.mrb[26].mxu1 }
 0x9c6   : > { %v1951_v39 = vmul.f32 0.17677669, %v1895_v37  ;;  %v3294_v40 = vpop.f32.mrb[27].mxu1  ;;  %v1954_v41 = vsel %vm1169_vm2, %v1950_v34, -inf }
 0x9c7   : > { %1955 = vmax.xlane.f32.xlu0 %v1954_v41  ;;  %v3407_v40 = vld [vmem:[%s3744_s25 + $0x8] sm:$0xff]   ;;  %v3408_v41 = vld [vmem:[%s3744_s25 + $0x10] sm:$0xff]  }
 0x9c8   : > { %v1957_v42 = vsel %vm1169_vm2, %v1951_v39, -inf }
 0x9c9   : > { %1958 = vmax.xlane.f32.xlu1 %v1957_v42  ;;  %v3409_v42 = vld [vmem:[%s3744_s25 + $0x18] sm:$0xff]  }
 0x9ce   : > { %v1820_v44 = vpop.f32.mrb[32].mxu0 }
 0x9cf   : > { %v3287_v45 = vpop.f32.mrb[33].mxu0 }
 0x9d0   : > { %v1823_v46 = vpop.f32.mrb[34].mxu0  ;;  %v3411_v45 = vld [vmem:[%s3744_s25 + $0x28] sm:$0xff]  }
 0x9d1   : > { %v3288_v17 = vpop.f32.mrb[35].mxu0 }
 0x9d6   : > { %v1943_v47 = vpop.f32.mrb[36].mxu0 }
 0x9d7   : > { %v1952_v49 = vmul.f32 0.17677669, %v1943_v47  ;;  %v3299_v51 = vpop.f32.mrb[37].mxu0 }
 0x9d8   : > { %v1946_v52 = vpop.f32.mrb[38].mxu0 }
 0x9d9   : > { %v1953_v53 = vmul.f32 0.17677669, %v1946_v52  ;;  %v3300_v54 = vpop.f32.mrb[39].mxu0  ;;  %v1960_v55 = vsel %vm1169_vm2, %v1952_v49, -inf  ;;  %v3413_v52 = vld [vmem:[%s3744_s25 + $0x38] sm:$0xff]  }
 0x9da   : > { %1961 = vmax.xlane.f32.xlu0 %v1960_v55 }
 0x9db   : > { %v1963_v56 = vsel %vm1169_vm2, %v1953_v53, -inf }
 0x9de   : > { %1964 = vmax.xlane.f32.xlu0 %v1963_v56 }
 0xa54   : > { %v1956_v59 = vpop.xlane.xlu0 %1955 }
 0xa55   : > { %v1966_v60 = vsub.f32 %v1950_v34, %v1956_v59 }
 0xa56   : > { %v1959_v61 = vpop.xlane.xlu1 %1958 }
 0xa57   : > { %v1970_v62 = vmul.f32 1.442695, %v1966_v60  ;;  %v1967_v63 = vsub.f32 %v1951_v39, %v1959_v61  ;;  %v3406_v39 = vld [vmem:[%s3744_s25] sm:$0xff]  }
 0xa59   : > { %3510 = vpow2.f32 %v1970_v62  ;;  %v1972_v0 = vmul.f32 1.442695, %v1967_v63 }
 0xa5b   : > { %3512 = vpow2.f32 %v1972_v0 }
 0xa63   : > { %v3511_v1 = vpop.eup %3510 }
 0xa64   : > { %v1978_v2 = vsel %vm1169_vm2, %v3511_v1, 0.0 }
 0xa65   : > { %v3513_v38 = vpop.eup %3512  ;;  %1979 = vadd.xlane.f32.xlu0 %v1978_v2 }
 0xa66   : > { %v1981_v3 = vsel %vm1169_vm2, %v3513_v38, 0.0 }
 0xa67   : > { %1982 = vadd.xlane.f32.xlu1 %v1981_v3  ;;  %v1962_v4 = vpop.xlane.xlu0 %1961 }
 0xa68   : > { %v1968_v5 = vsub.f32 %v1952_v49, %v1962_v4  ;;  %v3412_v49 = vld [vmem:[%s3744_s25 + $0x30] sm:$0xff]   ;;  %v3063_v4 = vld [vmem:[%s4269_s19] ss:$0 sm:$0xff] }
 0xa6a   : > { %v1974_v6 = vmul.f32 1.442695, %v1968_v5 }
 0xa6b   : > { %v1965_v7 = vpop.xlane.xlu0 %1964 }
 0xa6c   : > { %3514 = vpow2.f32 %v1974_v6  ;;  %v1969_v8 = vsub.f32 %v1953_v53, %v1965_v7 }
 0xa6e   : > { %v1976_v9 = vmul.f32 1.442695, %v1969_v8 }
 0xa70   : > { %3516 = vpow2.f32 %v1976_v9 }
 0xa76   : > { %v3515_v36 = vpop.eup %3514 }
 0xa77   : > { %v1984_v10 = vsel %vm1169_vm2, %v3515_v36, 0.0 }
 0xa78   : > { %1985 = vadd.xlane.f32.xlu0 %v1984_v10  ;;  %v3550_v10 = vld [vmem:[#allocation2] sm:$0xff] }
 0xa7a   : > { %v3517_v57 = vpop.eup %3516 }
 0xa7b   : > { %v1987_v58 = vsel %vm1169_vm2, %v3517_v57, 0.0 }
 0xa7c   : > { %1988 = vadd.xlane.f32.xlu1 %v1987_v58 }
 0xa8d   : > { %2047 = vrot.lane.b32.xlu1 %v3880_v48, %s3621_s20 }
 0xa8e   : > { %2000 = vrot.lane.b32.xlu0 %v3882_v50, %s3621_s20 }
 0xa91   : > { %1564 = vrot.lane.b32.xlu1 %v3978_v12, %s3621_s20 }
 0xa92   : > { %1568 = vrot.lane.b32.xlu0 %v3984_v28, %s3621_s20 }
 0xa95   : > { %1566 = vrot.lane.b32.xlu1 %v3980_v14, %s3621_s20 }
 0xa96   : > { %1831 = vrot.lane.b32.xlu0 %v1773_v27, %s3620_s14 }
 0xa99   : > { %1570 = vrot.lane.b32.xlu1 %v3986_v30, %s3621_s20 }
 0xa9a   : > { %1835 = vrot.lane.b32.xlu0 %v1820_v44, %s3620_s14  ;;  %v3410_v44 = vld [vmem:[%s3744_s25 + $0x20] sm:$0xff]  }
 0xa9d   : > { %1833 = vrot.lane.b32.xlu1 %v1776_v31, %s3620_s14 }
 0xaa1   : > { %1837 = vrot.lane.b32.xlu1 %v1823_v46, %s3620_s14 }
 0xaf2   : > { %v1980_v50 = vpop.xlane.xlu0 %1979 }
 0xaf4   : > { %v1983_v48 = vpop.xlane.xlu1 %1982 }
 0xaf5   : > { %3518 = vrcp.f32 %v1983_v48  ;;  %v3551_v48 = vld [vmem:[#allocation2 + $0x8] sm:$0xff] }
 0xaf6   : > { %3520 = vrcp.f32 %v1980_v50 }
 0xaff   : > { %v3519_v12 = vpop.eup %3518 }
 0xb00   : > { %v3521_v11 = vpop.eup %3520  ;;  %v1995_v13 = vmul.f32 %v3519_v12, %v3513_v38  ;;  %v3552_v12 = vld [vmem:[#allocation2 + $0x10] sm:$0xff] }
 0xb01   : > { %v1994_v14 = vmul.f32 %v3521_v11, %v3511_v1 }
 0xb03   : > { %v1998_v30 = vpack.c.bf16 %v1995_v13, %v1994_v14  ;;  %v3553_v13 = vld [vmem:[#allocation2 + $0x18] sm:$0xff] }
 0xb05   : > { %v1986_v28 = vpop.xlane.xlu0 %1985 }
 0xb06   : > { %3522 = vrcp.f32 %v1986_v28 }
 0xb09   : > { %v1989_v15 = vpop.xlane.xlu1 %1988  ;;  %v2001_v16 = vpop.permute.xlu0 %2000 }
 0xb0a   : > { %3524 = vrcp.f32 %v1989_v15  ;;  %3302 = vmatpush3.bf16.msra.mxu1 %v2001_v16  ;;  %v3414_v15 = vld [vmem:[%s3772_s3] ss:$8 sps:$4 sm:$0xff]   ;;  %v3416_v16 = vld [vmem:[%s3772_s3 + $0x4] ss:$8 sps:$4 sm:$0xff]  }
 0xb0b   : > { %3313 = vmatprep.subr.bf16.mxu1 %v3406_v39 }
 0xb0d   : > { %v2048_v18 = vpop.permute.xlu1 %2047  ;;  %3304 = vmatmul.mubr.msk.bf16.vlgmr.msra.gmra.mrb[28].mxu1 %vm1169_vm2, %v1998_v30  ;;  %v1569_v21 = vpop.permute.xlu0 %1568  ;;  %v3419_v30 = vld [vmem:[%s3772_s3 + $0x14] ss:$8 sps:$4 sm:$0xff]  }
 0xb0e   : > { %1579 = vst.msk [vmem:[#allocation3 + $0x10] sm:$0xff] %vm1576_vm3, %v1569_v21  ;;  %3308 = vmatpush3.bf16.msra.mxu0 %v2048_v18  ;;  %3314 = vmatpush3.bf16.msra.mxu1 %v3406_v39  ;;  %v3417_v18 = vld [vmem:[%s3772_s3 + $0x10] ss:$8 sps:$4 sm:$0xff]  }
 0xb0f   : > { %3315 = vmatprep.subr.bf16.mxu1 %v3407_v40  ;;  %2421 = vmatprep.subr.bf16.mxu0 %v3416_v16 }
 0xb10   : > { %v3523_v25 = vpop.eup %3522 }
 0xb11   : > { %v1565_v23 = vpop.permute.xlu1 %1564  ;;  %v1832_v24 = vpop.permute.xlu0 %1831  ;;  %v1996_v27 = vmul.f32 %v3523_v25, %v3515_v36 }
 0xb12   : > { %1577 = vst.msk [vmem:[#allocation3] sm:$0xff] %vm1576_vm3, %v1565_v23  ;;  %3316 = vmatpush3.bf16.msra.mxu1 %v3407_v40 }
 0xb13   : > { %1844 = vst.msk [vmem:[#allocation3] sm:$0xff] %vm1843_vm4, %v1832_v24  ;;  %3317 = vmatprep.subr.bf16.mxu1 %v3408_v41 }
 0xb14   : > { %v3525_v26 = vpop.eup %3524 }
 0xb15   : > { %v1997_v29 = vmul.f32 %v3525_v26, %v3517_v57  ;;  %v1567_v31 = vpop.permute.xlu1 %1566  ;;  %v1836_v32 = vpop.permute.xlu0 %1835 }
 0xb16   : > { %1578 = vst.msk [vmem:[#allocation3 + $0x8] sm:$0xff] %vm1576_vm3, %v1567_v31  ;;  %3318 = vmatpush3.bf16.msra.mxu1 %v3408_v41 }
 0xb17   : > { %1846 = vst.msk [vmem:[#allocation3 + $0x10] sm:$0xff] %vm1843_vm4, %v1836_v32  ;;  %v1999_v33 = vpack.c.bf16 %v1997_v29, %v1996_v27  ;;  %3319 = vmatprep.subr.bf16.mxu1 %v3409_v42 }
 0xb19   : > { %v1571_v34 = vpop.permute.xlu1 %1570  ;;  %3310 = vmatmul.mubr.msk.bf16.vlgmr.msra.gmra.mrb[40].mxu0 %vm1169_vm2, %v1999_v33 }
 0xb1a   : > { %1580 = vst.msk [vmem:[#allocation3 + $0x18] sm:$0xff] %vm1576_vm3, %v1571_v34  ;;  %2453 = vmatprep.mubr.bf16.mxu0 %v3616_v43  ;;  %3320 = vmatpush3.bf16.msra.mxu1 %v3409_v42  ;;  %v3422_v42 = vld [vmem:[%s3772_s3 + $0x24] ss:$8 sps:$4 sm:$0xff]  }
 0xb1b   : > { %3321 = vmatprep.subr.bf16.mxu1 %v3410_v44  ;;  %2422 = vmatpush1.bf16.msra.mxu0 %v3414_v15 }
 0xb1c   : > { %2423 = vmatprep.subr.bf16.mxu0 %v3419_v30 }
 0xb1d   : > { %v1834_v35 = vpop.permute.xlu1 %1833 }
 0xb1e   : > { %1845 = vst.msk [vmem:[#allocation3 + $0x8] sm:$0xff] %vm1843_vm4, %v1834_v35  ;;  %3322 = vmatpush3.bf16.msra.mxu1 %v3410_v44  ;;  %v3420_v44 = vld [vmem:[%s3772_s3 + $0x20] ss:$8 sps:$4 sm:$0xff]  }
 0xb1f   : > { %3323 = vmatprep.subr.bf16.mxu1 %v3411_v45  ;;  %2424 = vmatpush1.bf16.msra.mxu0 %v3417_v18 }
 0xb20   : > { %2425 = vmatprep.subr.bf16.mxu0 %v3422_v42  ;;  %v3451_v42 = vld [vmem:[%s3783_s2 + $0x30] sm:$0xff]  }
 0xb21   : > { %v1838_v37 = vpop.permute.xlu1 %1837 }
 0xb22   : > { %1847 = vst.msk [vmem:[#allocation3 + $0x18] sm:$0xff] %vm1843_vm4, %v1838_v37  ;;  %3324 = vmatpush3.bf16.msra.mxu1 %v3411_v45  ;;  %v3425_v45 = vld [vmem:[%s3772_s3 + $0x34] ss:$8 sps:$4 sm:$0xff]  }
 0xb23   : > { %3325 = vmatprep.subr.bf16.mxu1 %v3412_v49  ;;  %2426 = vmatpush1.bf16.msra.mxu0 %v3420_v44  ;;  %v3452_v44 = vld [vmem:[%s3783_s2 + $0x78] sm:$0xff]  }
 0xb24   : > { %2427 = vmatprep.subr.bf16.mxu0 %v3425_v45  ;;  %v3453_v45 = vld [vmem:[%s3783_s2 + $0x38] sm:$0xff]  }
 0xb26   : > { %3326 = vmatpush3.bf16.msra.mxu1 %v3412_v49  ;;  %v3431_v49 = vld [vmem:[%s3772_s3 + $0x54] ss:$8 sps:$4 sm:$0xff]  }
 0xb27   : > { %3327 = vmatprep.subr.bf16.mxu1 %v3413_v52 }
 0xb2a   : > { %3328 = vmatpush3.bf16.msra.mxu1 %v3413_v52  ;;  %v3434_v52 = vld [vmem:[%s3772_s3 + $0x64] ss:$8 sps:$4 sm:$0xff]  }
 0xbe0   : > { %v2040_v46 = vpop.f32.mrb[28].mxu1 }
 0xbe1   : > { %2098 = vrot.lane.b32.xlu0 %v2040_v46, %s3619_s29  ;;  %v3305_v17 = vpop.f32.mrb[29].mxu1  ;;  %v3423_v46 = vld [vmem:[%s3772_s3 + $0x30] ss:$8 sps:$4 sm:$0xff]  }
 0xbe2   : > { %v2043_v47 = vpop.f32.mrb[30].mxu1  ;;  %2428 = vmatpush1.bf16.msra.mxu0 %v3423_v46  ;;  %v3428_v17 = vld [vmem:[%s3772_s3 + $0x44] ss:$8 sps:$4 sm:$0xff]   ;;  %v2329_v46 = vld [vmem:[%s3778_s17] sm:$0x3] }
 0xbe3   : > { %2100 = vrot.lane.b32.xlu1 %v2043_v47, %s3619_s29  ;;  %v3306_v51 = vpop.f32.mrb[31].mxu1  ;;  %v3426_v47 = vld [vmem:[%s3772_s3 + $0x40] ss:$8 sps:$4 sm:$0xff]   ;;  %2429 = vmatprep.subr.bf16.mxu0 %v3428_v17  ;;  %v2334_v17 = vrot.slane %v2329_v46, %v821_v20 }
 0xbe4   : > { %v3429_v51 = vld [vmem:[%s3772_s3 + $0x50] ss:$8 sps:$4 sm:$0xff]  }
 0xbe6   : > { %2430 = vmatpush1.bf16.msra.mxu0 %v3426_v47  ;;  %v2338_v47 = vrot.slane %v2329_v46, %v825_v22 }
 0xbe7   : > { %2431 = vmatprep.subr.bf16.mxu0 %v3431_v49 }
 0xbea   : > { %2432 = vmatpush1.bf16.msra.mxu0 %v3429_v51 }
 0xbeb   : > { %2433 = vmatprep.subr.bf16.mxu0 %v3434_v52 }
 0xbec   : > { %v2087_v53 = vpop.f32.mrb[40].mxu0 }
 0xbed   : > { %2102 = vrot.lane.b32.xlu0 %v2087_v53, %s3619_s29  ;;  %v3311_v54 = vpop.f32.mrb[41].mxu0  ;;  %v3432_v53 = vld [vmem:[%s3772_s3 + $0x60] ss:$8 sps:$4 sm:$0xff]  }
 0xbee   : > { %v2090_v55 = vpop.f32.mrb[42].mxu0  ;;  %v3437_v54 = vld [vmem:[%s3772_s3 + $0x74] ss:$8 sps:$4 sm:$0xff]   ;;  %2434 = vmatpush1.bf16.msra.mxu0 %v3432_v53 }
 0xbef   : > { %2104 = vrot.lane.b32.xlu1 %v2090_v55, %s3619_s29  ;;  %v3312_v56 = vpop.f32.mrb[43].mxu0  ;;  %v3435_v55 = vld [vmem:[%s3772_s3 + $0x70] ss:$8 sps:$4 sm:$0xff]   ;;  %2435 = vmatprep.subr.bf16.mxu0 %v3437_v54 }
 0xbf2   : > { %2436 = vmatpush1.bf16.msra.mxu0 %v3435_v55 }
 0xc53   : > { %v2099_v59 = vpop.permute.xlu0 %2098 }
 0xc54   : > { %2111 = vst.msk [vmem:[#allocation3] sm:$0xff] %vm2110_vm5, %v2099_v59 }
 0xc55   : > { %v2101_v60 = vpop.permute.xlu1 %2100 }
 0xc56   : > { %2112 = vst.msk [vmem:[#allocation3 + $0x8] sm:$0xff] %vm2110_vm5, %v2101_v60 }
 0xc5b   : > { %v2115_v61 = vld [vmem:[#allocation3] sm:$0xff] }
 0xc5d   : > { %v2116_v62 = vld [vmem:[#allocation3 + $0x8] sm:$0xff] }
 0xc5e   : > { %v2119_v63 = vpack.c.bf16 %v2116_v62, %v2115_v61 }
 0xc5f   : > { %v2103_v0 = vpop.permute.xlu0 %2102 }
 0xc60   : > { %2113 = vst.msk [vmem:[#allocation3 + $0x10] sm:$0xff] %vm2110_vm5, %v2103_v0  ;;  %3329 = vmatprep.mubr.bf16.mxu1 %v2119_v63 }
 0xc61   : > { %v2105_v1 = vpop.permute.xlu1 %2104 }
 0xc62   : > { %2114 = vst.msk [vmem:[#allocation3 + $0x18] sm:$0xff] %vm2110_vm5, %v2105_v1 }
 0xc67   : > { %v2117_v2 = vld [vmem:[#allocation3 + $0x10] sm:$0xff] }
 0xc69   : > { %v2118_v38 = vld [vmem:[#allocation3 + $0x18] sm:$0xff] }
 0xc6a   : > { %v2120_v3 = vpack.c.bf16 %v2118_v38, %v2117_v2 }
 0xc6c   : > { %3330 = vmatmul.mubr.bf16.vlgmr.msra.gmra.mrb[32].mxu1 %v2120_v3 }
 0xd3f   : > { %v3331_v5 = vpop.f32.mrb[32].mxu1 }
 0xd40   : > { %v2226_v6 = vpop.f32.mrb[33].mxu1  ;;  %v2235_v36 = vadd.f32 %v3331_v5, %v3063_v4 }
 0xd41   : > { %v2227_v7 = vadd.f32 %v3063_v4, %v2226_v6  ;;  %v3332_v8 = vpop.f32.mrb[34].mxu1  ;;  %v3072_v6 = vld [vmem:[%s677_s21] ss:$0 sm:$0xff] }
 0xd42   : > { %v2229_v9 = vpop.f32.mrb[35].mxu1  ;;  %v4081_v28 = vadd.f32 %v3552_v12, %v2235_v36  ;;  %v2238_v11 = vadd.f32 %v3332_v8, %v3063_v4 }
 0xd43   : > { %v4076_v57 = vadd.f32 %v3550_v10, %v2227_v7  ;;  %v2230_v58 = vadd.f32 %v3063_v4, %v2229_v9 }
 0xd44   : > { %v4085_v14 = vadd.f32 %v3553_v13, %v2238_v11 }
 0xd45   : > { %v4078_v50 = vadd.f32 %v3551_v48, %v2230_v58  ;;  %2247 = vadd.xlane.f32.xlu0 %v4076_v57  ;;  %v3073_v58 = vld [vmem:[%s4270_s28] ss:$0 sm:$0xff] }
 0xd47   : > { %2249 = vadd.xlane.f32.xlu1 %v4078_v50 }
 0xd49   : > { %2251 = vadd.xlane.f32.xlu0 %v4081_v28 }
 0xd4d   : > { %2253 = vadd.xlane.f32.xlu0 %v4085_v14 }
 0xdd2   : > { %v2248_v21 = vpop.xlane.xlu0 %2247 }
 0xdd3   : > { %v2255_v23 = vmul.f32 0.0078125, %v2248_v21 }
 0xdd4   : > { %v2250_v24 = vpop.xlane.xlu1 %2249 }
 0xdd5   : > { %v2259_v25 = vsub.f32 %v4076_v57, %v2255_v23  ;;  %v2256_v26 = vmul.f32 0.0078125, %v2250_v24 }
 0xdd6   : > { %v2252_v27 = vpop.xlane.xlu0 %2251 }
 0xdd7   : > { %v2260_v29 = vsub.f32 %v4078_v50, %v2256_v26  ;;  %v2257_v31 = vmul.f32 0.0078125, %v2252_v27  ;;  %v2263_v32 = vmul.f32 %v2259_v25, %v2259_v25  ;;  %v3438_v26 = vld [vmem:[%s3783_s2 + $0x40] sm:$0xff]  }
 0xdd8   : > { %v3439_v27 = vld [vmem:[%s3783_s2] sm:$0xff]   ;;  %3169 = vmatprep.subr.bf16.mxu1 %v3438_v26 }
 0xdd9   : > { %v2261_v33 = vsub.f32 %v4081_v28, %v2257_v31  ;;  %2267 = vadd.xlane.f32.xlu0 %v2263_v32  ;;  %v2264_v34 = vmul.f32 %v2260_v29, %v2260_v29  ;;  %3170 = vmatpush3.bf16.msra.mxu1 %v3439_v27  ;;  %v3441_v31 = vld [vmem:[%s3783_s2 + $0x8] sm:$0xff]   ;;  %v3443_v32 = vld [vmem:[%s3783_s2 + $0x10] sm:$0xff]  }
 0xdda   : > { %v2254_v35 = vpop.xlane.xlu0 %2253 }
 0xddb   : > { %v2258_v37 = vmul.f32 0.0078125, %v2254_v35  ;;  %2269 = vadd.xlane.f32.xlu1 %v2264_v34  ;;  %v2265_v39 = vmul.f32 %v2261_v33, %v2261_v33  ;;  %v3445_v34 = vld [vmem:[%s3783_s2 + $0x18] sm:$0xff]   ;;  %v3446_v35 = vld [vmem:[%s3783_s2 + $0x60] sm:$0xff]  }
 0xddd   : > { %v2262_v40 = vsub.f32 %v4085_v14, %v2258_v37  ;;  %2271 = vadd.xlane.f32.xlu0 %v2265_v39  ;;  %v3447_v37 = vld [vmem:[%s3783_s2 + $0x20] sm:$0xff]   ;;  %v3448_v39 = vld [vmem:[%s3783_s2 + $0x68] sm:$0xff]  }
 0xddf   : > { %v2266_v41 = vmul.f32 %v2262_v40, %v2262_v40 }
 0xde1   : > { %2273 = vadd.xlane.f32.xlu1 %v2266_v41  ;;  %v3450_v41 = vld [vmem:[%s3783_s2 + $0x70] sm:$0xff]  }
 0xe66   : > { %v2268_v56 = vpop.xlane.xlu0 %2267 }
 0xe67   : > { %v2275_v59 = vmul.f32 0.0078125, %v2268_v56 }
 0xe68   : > { %v2270_v60 = vpop.xlane.xlu1 %2269 }
 0xe69   : > { %v2279_v61 = vadd.f32 2e-06, %v2275_v59  ;;  %v2276_v62 = vmul.f32 0.0078125, %v2270_v60 }
 0xe6a   : > { %v2272_v63 = vpop.xlane.xlu0 %2271 }
 0xe6b   : > { %3526 = vrsqrt.f32 %v2279_v61  ;;  %v2280_v0 = vadd.f32 2e-06, %v2276_v62  ;;  %v2277_v1 = vmul.f32 0.0078125, %v2272_v63 }
 0xe6d   : > { %3528 = vrsqrt.f32 %v2280_v0  ;;  %v2281_v2 = vadd.f32 2e-06, %v2277_v1 }
 0xe6e   : > { %v2274_v38 = vpop.xlane.xlu1 %2273 }
 0xe6f   : > { %3530 = vrsqrt.f32 %v2281_v2  ;;  %v2278_v3 = vmul.f32 0.0078125, %v2274_v38 }
 0xe71   : > { %v2282_v4 = vadd.f32 2e-06, %v2278_v3 }
 0xe73   : > { %3532 = vrsqrt.f32 %v2282_v4 }
 0xe75   : > { %v3527_v5 = vpop.eup %3526 }
 0xe76   : > { %v2287_v7 = vmul.f32 %v3527_v5, %v2259_v25 }
 0xe77   : > { %v3529_v8 = vpop.eup %3528 }
 0xe78   : > { %v2288_v9 = vmul.f32 %v3529_v8, %v2260_v29  ;;  %v2297_v36 = vmul.f32 %v3072_v6, %v2287_v7  ;;  %v3440_v29 = vld [vmem:[%s3783_s2 + $0x48] sm:$0xff]  }
 0xe79   : > { %v3531_v10 = vpop.eup %3530  ;;  %3171 = vmatprep.subr.bf16.mxu1 %v3440_v29 }
 0xe7a   : > { %v2298_v48 = vmul.f32 %v3072_v6, %v2288_v9  ;;  %v2307_v12 = vadd.f32 %v3073_v58, %v2297_v36  ;;  %v2289_v13 = vmul.f32 %v3531_v10, %v2261_v33  ;;  %3172 = vmatpush3.bf16.msra.mxu1 %v3441_v31  ;;  %v3444_v33 = vld [vmem:[%s3783_s2 + $0x58] sm:$0xff]  }
 0xe7c   : > { %v2308_v11 = vadd.f32 %v3073_v58, %v2298_v48  ;;  %v2299_v18 = vmul.f32 %v3072_v6, %v2289_v13 }
 0xe7d   : > { %v3533_v15 = vpop.eup %3532 }
 0xe7e   : > { %v2311_v16 = vpack.c.bf16 %v2308_v11, %v2307_v12  ;;  %v2290_v30 = vmul.f32 %v3533_v15, %v2262_v40  ;;  %v2309_v24 = vadd.f32 %v3073_v58, %v2299_v18  ;;  %v3449_v40 = vld [vmem:[%s3783_s2 + $0x28] sm:$0xff]  }
 0xe80   : > { %2454 = vmatmul.mubr.bf16.vlgmr.msra.gmra.mrb[44].mxu0 %v2311_v16  ;;  %v2300_v21 = vmul.f32 %v3072_v6, %v2290_v30 }
 0xe81   : > { %2463 = vmatprep.mubr.bf16.mxu0 %v3616_v43  ;;  %v3442_v43 = vld [vmem:[%s3783_s2 + $0x50] sm:$0xff]   ;;  %s4271_s2 = sld [smem:[#allocation13_spill]] (!%p3107_p6) }
 0xe82   : > { %v2310_v23 = vadd.f32 %v3073_v58, %v2300_v21  ;;  %3173 = vmatprep.subr.bf16.mxu1 %v3442_v43 }
 0xe83   : > { %3174 = vmatpush3.bf16.msra.mxu1 %v3443_v32 }
 0xe84   : > { %v2312_v25 = vpack.c.bf16 %v2310_v23, %v2309_v24  ;;  %3175 = vmatprep.subr.bf16.mxu1 %v3444_v33 }
 0xe87   : > { %3176 = vmatpush3.bf16.msra.mxu1 %v3445_v34 }
 0xe88   : > { %2464 = vmatmul.mubr.bf16.gmra.mrb[48].mxu0 %v2312_v25  ;;  %3177 = vmatprep.subr.bf16.mxu1 %v3446_v35 }
 0xe8b   : > { %3178 = vmatpush3.bf16.msra.mxu1 %v3447_v37 }
 0xe8c   : > { %3179 = vmatprep.subr.bf16.mxu1 %v3448_v39 }
 0xe8f   : > { %3180 = vmatpush3.bf16.msra.mxu1 %v3449_v40 }
 0xe90   : > { %3181 = vmatprep.subr.bf16.mxu1 %v3450_v41 }
 0xe93   : > { %3182 = vmatpush3.bf16.msra.mxu1 %v3451_v42 }
 0xe94   : > { %3183 = vmatprep.subr.bf16.mxu1 %v3452_v44 }
 0xe97   : > { %3184 = vmatpush3.bf16.msra.mxu1 %v3453_v45 }
 0xf53   : > { %v2455_v49 = vpop.f32.mrb[44].mxu0 }
 0xf54   : > { %v4140_v51 = vadd.f32 %v2455_v49, %v2334_v17  ;;  %v2457_v52 = vpop.f32.mrb[45].mxu0 }
 0xf55   : > { %v4142_v53 = vadd.f32 %v2457_v52, %v2338_v47  ;;  %v2459_v54 = vpop.f32.mrb[46].mxu0 }
 0xf56   : > { %v2482_v55 = vmul.f32 0.044715, %v4140_v51  ;;  %v4145_v56 = vadd.f32 %v2459_v54, %v2334_v17  ;;  %v2461_v59 = vpop.f32.mrb[47].mxu0  ;;  %v2474_v54 = vmul.f32 0.5, %v4140_v51 }
 0xf57   : > { %v2483_v60 = vmul.f32 0.044715, %v4142_v53  ;;  %v4148_v61 = vadd.f32 %v2461_v59, %v2338_v47 }
 0xf58   : > { %v2490_v20 = vmul.f32 %v2482_v55, %v4140_v51  ;;  %v2484_v19 = vmul.f32 0.044715, %v4145_v56  ;;  %v2476_v55 = vmul.f32 0.5, %v4145_v56 }
 0xf59   : > { %v2491_v22 = vmul.f32 %v2483_v60, %v4142_v53  ;;  %v2485_v62 = vmul.f32 0.044715, %v4148_v61  ;;  %v2475_v60 = vmul.f32 0.5, %v4142_v53 }
 0xf5a   : > { %v2498_v63 = vmul.f32 %v2490_v20, %v4140_v51  ;;  %v2492_v0 = vmul.f32 %v2484_v19, %v4145_v56  ;;  %v2477_v20 = vmul.f32 0.5, %v4148_v61 }
 0xf5b   : > { %v2499_v1 = vmul.f32 %v2491_v22, %v4142_v53  ;;  %v2493_v2 = vmul.f32 %v2485_v62, %v4148_v61  ;;  %v2465_v38 = vpop.f32.mrb[48].mxu0 }
 0xf5c   : > { %v2506_v3 = vadd.f32 %v2498_v63, %v4140_v51  ;;  %v2500_v4 = vmul.f32 %v2492_v0, %v4145_v56  ;;  %v4160_v5 = vadd.f32 %v2465_v38, %v2334_v17  ;;  %v2467_v6 = vpop.f32.mrb[49].mxu0 }
 0xf5d   : > { %v2501_v7 = vmul.f32 %v2493_v2, %v4148_v61  ;;  %v4163_v8 = vadd.f32 %v2467_v6, %v2338_v47  ;;  %v2469_v9 = vpop.f32.mrb[50].mxu0  ;;  %v2507_v36 = vadd.f32 %v2499_v1, %v4142_v53 }
 0xf5e   : > { %v2514_v10 = vmul.f32 0.7978845, %v2506_v3  ;;  %v2508_v58 = vadd.f32 %v2500_v4, %v4145_v56  ;;  %v2486_v48 = vmul.f32 0.044715, %v4160_v5  ;;  %v2470_v12 = vadd.f32 %v2469_v9, %v2334_v17  ;;  %v2471_v11 = vpop.f32.mrb[51].mxu0 }
 0xf5f   : > { %v2487_v13 = vmul.f32 0.044715, %v4163_v8  ;;  %v2472_v15 = vadd.f32 %v2471_v11, %v2338_v47  ;;  %v2509_v16 = vadd.f32 %v2501_v7, %v4148_v61  ;;  %v2515_v30 = vmul.f32 0.7978845, %v2507_v36 }
 0xf60   : > { %3534 = vtanh.f32 %v2514_v10  ;;  %v2516_v18 = vmul.f32 0.7978845, %v2508_v58  ;;  %v2494_v21 = vmul.f32 %v2486_v48, %v4160_v5  ;;  %v2488_v23 = vmul.f32 0.044715, %v2470_v12 }
 0xf61   : > { %v2495_v24 = vmul.f32 %v2487_v13, %v4163_v8  ;;  %v2489_v25 = vmul.f32 0.044715, %v2472_v15  ;;  %v2517_v26 = vmul.f32 0.7978845, %v2509_v16  ;;  %3536 = vtanh.f32 %v2515_v30 }
 0xf62   : > { %3538 = vtanh.f32 %v2516_v18  ;;  %v2502_v27 = vmul.f32 %v2494_v21, %v4160_v5  ;;  %v2496_v29 = vmul.f32 %v2488_v23, %v2470_v12  ;;  %v2478_v53 = vmul.f32 0.5, %v4160_v5 }
 0xf63   : > { %v2503_v31 = vmul.f32 %v2495_v24, %v4163_v8  ;;  %v2497_v43 = vmul.f32 %v2489_v25, %v2472_v15  ;;  %3540 = vtanh.f32 %v2517_v26  ;;  %v2480_v56 = vmul.f32 0.5, %v2470_v12 }
 0xf64   : > { %v2504_v32 = vmul.f32 %v2496_v29, %v2470_v12  ;;  %v2510_v33 = vadd.f32 %v2502_v27, %v4160_v5  ;;  %v2479_v9 = vmul.f32 0.5, %v4163_v8  ;;  %v2481_v36 = vmul.f32 0.5, %v2472_v15  ;;  %v3090_v5 = vld [vmem:[%s697_s24] ss:$0 sm:$0xff] }
 0xf65   : > { %v2505_v34 = vmul.f32 %v2497_v43, %v2472_v15  ;;  %v2511_v35 = vadd.f32 %v2503_v31, %v4163_v8 }
 0xf66   : > { %v2512_v37 = vadd.f32 %v2504_v32, %v2470_v12  ;;  %v2518_v39 = vmul.f32 0.7978845, %v2510_v33 }
 0xf67   : > { %v2513_v40 = vadd.f32 %v2505_v34, %v2472_v15  ;;  %v2519_v41 = vmul.f32 0.7978845, %v2511_v35 }
 0xf68   : > { %v2520_v42 = vmul.f32 0.7978845, %v2512_v37  ;;  %3542 = vtanh.f32 %v2518_v39 }
 0xf69   : > { %v2521_v44 = vmul.f32 0.7978845, %v2513_v40  ;;  %3544 = vtanh.f32 %v2519_v41 }
 0xf6a   : > { %v3535_v45 = vpop.eup %3534  ;;  %3546 = vtanh.f32 %v2520_v42 }
 0xf6b   : > { %v3537_v46 = vpop.eup %3536  ;;  %v2530_v17 = vadd.f32 1.0, %v3535_v45  ;;  %3548 = vtanh.f32 %v2521_v44 }
 0xf6c   : > { %v3539_v47 = vpop.eup %3538  ;;  %v2531_v49 = vadd.f32 1.0, %v3537_v46 }
 0xf6d   : > { %v3541_v52 = vpop.eup %3540  ;;  %v2532_v59 = vadd.f32 1.0, %v3539_v47  ;;  %v2538_v22 = vmul.f32 %v2530_v17, %v2474_v54 }
 0xf6e   : > { %v2533_v19 = vadd.f32 1.0, %v3541_v52  ;;  %v2539_v63 = vmul.f32 %v2531_v49, %v2475_v60 }
 0xf6f   : > { %v2540_v62 = vmul.f32 %v2532_v59, %v2476_v55 }
 0xf70   : > { %v2541_v0 = vmul.f32 %v2533_v19, %v2477_v20 }
 0xf71   : > { %v2546_v1 = vpack.c.bf16 %v2540_v62, %v2538_v22 }
 0xf72   : > { %v3543_v2 = vpop.eup %3542  ;;  %v2547_v38 = vpack.c.bf16 %v2541_v0, %v2539_v63 }
 0xf73   : > { %v3545_v3 = vpop.eup %3544  ;;  %v2534_v4 = vadd.f32 1.0, %v3543_v2 }
 0xf74   : > { %v3547_v6 = vpop.eup %3546  ;;  %2717 = vmatprep.mubr.bf16.mxu1 %v2547_v38  ;;  %v2535_v51 = vadd.f32 1.0, %v3545_v3 }
 0xf75   : > { %v3549_v7 = vpop.eup %3548  ;;  %2718 = vmatmul.mubr.bf16.vlgmr.msra.gmra.mrb[36].mxu1 %v2546_v1  ;;  %v2536_v61 = vadd.f32 1.0, %v3547_v6  ;;  %v2542_v58 = vmul.f32 %v2534_v4, %v2478_v53  ;;  %v3109_v53 = vld [vmem:[%s4272_s16] ss:$0 sm:$0xff] (!%p3107_p6) }
 0xf76   : > { %v2537_v10 = vadd.f32 1.0, %v3549_v7  ;;  %v2543_v11 = vmul.f32 %v2535_v51, %v2479_v9  ;;  %v3108_v51 = vld [vmem:[%s4271_s2] ss:$0 sm:$0xff] (!%p3107_p6) }
 0xf77   : > { %v2544_v48 = vmul.f32 %v2536_v61, %v2480_v56 }
 0xf78   : > { %v2545_v13 = vmul.f32 %v2537_v10, %v2481_v36 }
 0xf79   : > { %v2548_v16 = vpack.c.bf16 %v2544_v48, %v2542_v58 }
 0xf7a   : > { %v2549_v30 = vpack.c.bf16 %v2545_v13, %v2543_v11 }
 0xf7c   : > { %2725 = vmatprep.mubr.bf16.mxu1 %v2549_v30 }
 0xf7d   : > { %2726 = vmatmul.mubr.bf16.gmra.mrb[40].mxu1 %v2548_v16 }
0x1048   : > { %v3185_v18 = vpop.f32.mrb[36].mxu1 }
0x1049   : > { %v3186_v12 = vpop.f32.mrb[37].mxu1 }
0x104a   : > { %v3187_v21 = vadd.f32 %v3186_v12, %v3185_v18  ;;  %v3188_v23 = vpop.f32.mrb[38].mxu1 }
0x104b   : > { %v3189_v8 = vpop.f32.mrb[39].mxu1 }
0x104c   : > { %v2720_v15 = vadd.f32 %v3187_v21, %v3090_v5  ;;  %v3190_v24 = vadd.f32 %v3189_v8, %v3188_v23 }
0x104e   : > { %v2734_v25 = vadd.f32 %v2720_v15, %v4076_v57  ;;  %v2723_v26 = vadd.f32 %v3190_v24, %v3090_v5 }
0x1050   : > { %2738 = vst [vmem:[#allocation2] sm:$0xff] %v2734_v25  ;;  %v2735_v27 = vadd.f32 %v2723_v26, %v4078_v50  ;;  %v3191_v29 = vpop.f32.mrb[40].mxu1  ;;  %2748 = vadd.xlane.f32.xlu0 (!%p3107_p6), %v2734_v25 }
0x1051   : > { %v3192_v31 = vpop.f32.mrb[41].mxu1 }
0x1052   : > { %2739 = vst [vmem:[#allocation2 + $0x8] sm:$0xff] %v2735_v27  ;;  %v3193_v43 = vadd.f32 %v3192_v31, %v3191_v29  ;;  %v3194_v32 = vpop.f32.mrb[42].mxu1 }
0x1053   : > { %v3195_v33 = vpop.f32.mrb[43].mxu1 }
0x1054   : > { %v2728_v34 = vadd.f32 %v3193_v43, %v3090_v5  ;;  %v3196_v35 = vadd.f32 %v3195_v33, %v3194_v32  ;;  %2745 = sbr.rel (%p3107_p6) target bundleno = 4500 (0x1194), region = 88  ;;  %2750 = vadd.xlane.f32.xlu0 (!%p3107_p6), %v2735_v27 }
0x1056   : > { %v2736_v37 = vadd.f32 %v2728_v34, %v4081_v28  ;;  %v2731_v39 = vadd.f32 %v3196_v35, %v3090_v5 }
0x1058   : > { %2740 = vst [vmem:[#allocation2 + $0x10] sm:$0xff] %v2736_v37  ;;  %v2737_v40 = vadd.f32 %v2731_v39, %v4085_v14  ;;  %2752 = vadd.xlane.f32.xlu1 (!%p3107_p6), %v2736_v37 }
0x105a   : > { %2741 = vst [vmem:[#allocation2 + $0x18] sm:$0xff] %v2737_v40 }
0x105c   : > { %2754 = vadd.xlane.f32.xlu1 %v2737_v40 }
0x10dd   : > { %v2749_v57 = vpop.xlane.xlu0 %2748 }
0x10de   : > { %v2756_v41 = vmul.f32 0.0078125, %v2749_v57 }
0x10e0   : > { %v2760_v44 = vsub.f32 %v2734_v25, %v2756_v41 }
0x10e1   : > { %v2751_v46 = vpop.xlane.xlu0 %2750 }
0x10e2   : > { %v2757_v17 = vmul.f32 0.0078125, %v2751_v46  ;;  %v2764_v47 = vmul.f32 %v2760_v44, %v2760_v44 }
0x10e4   : > { %v2761_v14 = vsub.f32 %v2735_v27, %v2757_v17  ;;  %2768 = vadd.xlane.f32.xlu0 %v2764_v47 }
0x10e5   : > { %v2753_v50 = vpop.xlane.xlu1 %2752 }
0x10e6   : > { %v2758_v42 = vmul.f32 0.0078125, %v2753_v50  ;;  %v2765_v55 = vmul.f32 %v2761_v14, %v2761_v14 }
0x10e8   : > { %v2762_v45 = vsub.f32 %v2736_v37, %v2758_v42  ;;  %2770 = vadd.xlane.f32.xlu1 %v2765_v55 }
0x10e9   : > { %v2755_v28 = vpop.xlane.xlu1 %2754 }
0x10ea   : > { %v2759_v49 = vmul.f32 0.0078125, %v2755_v28  ;;  %v2766_v54 = vmul.f32 %v2762_v45, %v2762_v45 }
0x10ec   : > { %v2763_v52 = vsub.f32 %v2737_v40, %v2759_v49  ;;  %2772 = vadd.xlane.f32.xlu0 %v2766_v54 }
0x10ee   : > { %v2767_v59 = vmul.f32 %v2763_v52, %v2763_v52 }
0x10f0   : > { %2774 = vadd.xlane.f32.xlu1 %v2767_v59 }
0x1171   : > { %v2769_v60 = vpop.xlane.xlu0 %2768 }
0x1172   : > { %v2776_v20 = vmul.f32 0.0078125, %v2769_v60 }
0x1174   : > { %v2780_v19 = vadd.f32 2e-06, %v2776_v20 }
0x1175   : > { %v2771_v22 = vpop.xlane.xlu1 %2770 }
0x1176   : > { %3554 = vrsqrt.f32 %v2780_v19  ;;  %v2777_v63 = vmul.f32 0.0078125, %v2771_v22 }
0x1178   : > { %v2781_v1 = vadd.f32 2e-06, %v2777_v63 }
0x1179   : > { %v2773_v62 = vpop.xlane.xlu0 %2772 }
0x117a   : > { %v2778_v0 = vmul.f32 0.0078125, %v2773_v62  ;;  %3556 = vrsqrt.f32 %v2781_v1 }
0x117c   : > { %v2782_v2 = vadd.f32 2e-06, %v2778_v0 }
0x117d   : > { %v2775_v38 = vpop.xlane.xlu1 %2774 }
0x117e   : > { %v2779_v3 = vmul.f32 0.0078125, %v2775_v38  ;;  %3558 = vrsqrt.f32 %v2782_v2 }
0x1180   : > { %v2783_v4 = vadd.f32 2e-06, %v2779_v3  ;;  %v3555_v6 = vpop.eup %3554 }
0x1181   : > { %v2788_v7 = vmul.f32 %v3555_v6, %v2760_v44 }
0x1182   : > { %3560 = vrsqrt.f32 %v2783_v4 }
0x1183   : > { %v2798_v56 = vmul.f32 %v3108_v51, %v2788_v7 }
0x1184   : > { %v3557_v61 = vpop.eup %3556 }
0x1185   : > { %v2808_v36 = vadd.f32 %v3109_v53, %v2798_v56  ;;  %v2789_v10 = vmul.f32 %v3557_v61, %v2761_v14 }
0x1187   : > { %2812 = vst [vmem:[#allocation4] sm:$0xff] %v2808_v36  ;;  %v2799_v48 = vmul.f32 %v3108_v51, %v2789_v10 }
0x1188   : > { %v3559_v9 = vpop.eup %3558 }
0x1189   : > { %v2790_v58 = vmul.f32 %v3559_v9, %v2762_v45  ;;  %v2809_v16 = vadd.f32 %v3109_v53, %v2799_v48 }
0x118b   : > { %v2800_v13 = vmul.f32 %v3108_v51, %v2790_v58  ;;  %2813 = vst [vmem:[#allocation4 + $0x8] sm:$0xff] %v2809_v16 }
0x118c   : > { %v3561_v11 = vpop.eup %3560 }
0x118d   : > { %v2791_v30 = vmul.f32 %v3561_v11, %v2763_v52  ;;  %v2810_v18 = vadd.f32 %v3109_v53, %v2800_v13 }
0x118f   : > { %v2801_v5 = vmul.f32 %v3108_v51, %v2791_v30  ;;  %2814 = vst [vmem:[#allocation4 + $0x10] sm:$0xff] %v2810_v18 }
0x1191   : > { %v2811_v12 = vadd.f32 %v3109_v53, %v2801_v5 }
0x1193   : > { %2815 = vst [vmem:[#allocation4 + $0x18] sm:$0xff] %v2811_v12 }
0x1194 PF: > { %s4273_s22 = sld [smem:[#allocation8_spill]]  ;;  %s3622_s14 = smov [#allocation4]  }
0x1195   : > { %s2825_s20 = sshll.u32 %s3622_s14, 4  ;;  %s2826_s20 = int_to_ptr.vmem [resolvable:$true] %s2825_s20 }
0x1196   : > { %s3562_s25 = scalar_lea.vmem %s2826_s20, 512  ;;  %p3569_p11 = scmp.lt.s32.totalorder %s2826_s20, %s2826_s20 }
0x1197   : > { %p3563_p8 = scmp.ne.s32.totalorder %s2826_s20, %s3562_s25  ;;  %p3570_p12 = scmp.lt.s32.totalorder %s3562_s25, %s3562_s25 }
0x1199   : > { %p3571_p13 = por %p3570_p12, %p3569_p11 }
0x119a   : > { %s4274_s30 = sadd.s32 4294967295, %s4273_s22  }
0x119b   : > { %p4200_p7 = scmp.eq.s32.totalorder %s4274_s30, 1 }
0x119d   : > { %p3564_p9 = pnand %p3563_p8, %p4200_p7 }
0x119f   : > { %p3565_p10 = pneg %p3564_p9 }
0x11a1   : > { %p3572_p0 = pnand %p3571_p13, %p3565_p10 }
0x11a3   : > { %3575 = shalt.err (!%p3572_p0)
}
0x11a4   : > { %s4276_s3 = sld [smem:[#allocation15_spill]] }
0x11aa   : > { %s3576_s27 = scalar_lea.hbm %s4276_s3, 512 }
0x11ab   : > { %p3577_p1 = scmp.ne.s32.totalorder %s4276_s3, %s3576_s27  ;;  %p3582_p4 = scmp.lt.u32.totalorder %s3576_s27, %s4276_s3 }
0x11ad   : > { %p3578_p2 = pnand %p3577_p1, %p4200_p7 }
0x11af   : > { %p3579_p3 = pneg %p3578_p2 }
0x11b1   : > { %p3584_p5 = pnand %p3582_p4, %p3579_p3 }
0x11b3   : > { %3587 = shalt.err (!%p3584_p5)
}
0x11b4   : > { %s3623_s17 = smov 128   ;;  %s3624_s18 = smov 8  }
0x11b5   : > { %3336 = dma.vmem_to_hbm [thread:$0]  (%p4200_p7), %s2826_s20, 512, %s4276_s3, [#allocation5], %s3623_s17, %s3623_s17, %s3624_s18  }
0x11b6   : > { %3601 = dma.done.wait (%p4200_p7), [#allocation5], 512  }
0x11b7   : > { %3603 = vsyncadd (%p4200_p7), [#allocation5], 4294966784 }
0x11b8 PF: > { %s4277_s24 = sld [smem:[#allocation8_spill]]  ;;  %s4278_s18 = sld [smem:[#allocation7_spill]] }
0x11b9   : > { %s4279_s19 = sld [smem:[#allocation9_spill]] }
0x11be   : > { %s26_s20 = sadd.s32 1, %s4277_s24  }
0x11bf   : > { %p23_p6 = scmp.ge.s32.totalorder %s26_s20, 4  }
0x11c1   :  { %25 = sbr.rel (!%p23_p6) target bundleno = 9 (0x9), region = 152 }
0x11c8   :  { %2841 = vsyncpa [#allocation5], 1 }
0x11c9   :  { %2843 = vsyncpa [#allocation5 + $0x1], 1 }

</bundles_post_ra>
